<compile_context>
chip_gen: v7x
topology: tpu7x:2x2x1
jax: 0.10.0
libtpu: 0.0.40
codegen_flags: <defaults>
</compile_context>

<pallas_src>
from types import SimpleNamespace

import jax
import jax.numpy as jnp
from jax.experimental import pallas as pl
from jax.experimental.pallas import tpu as pltpu


# ---------------------------------------------------------------------------
# Fused kernel builder
# ---------------------------------------------------------------------------
def _make_net_kernel(T, B, H, L):
    """Builds the fused kernel for fixed (T, B, H, L).

    Fused gate column layout (width 8H), gate-major / direction-minor:
        [ i_f, i_b, f_f, f_b, g_f, g_b, o_f, o_b ]   (each block is H lanes)
    so that each 2H gate slice aligns with the packed state [h_fwd | h_bwd].
    """
    TWO_H = 2 * H
    G8 = 8 * H

    def kernel(x_ref, *refs):
        # inputs: wih_l, whh_l, bias_l  (x L), wlin, blin, h0p, c0p
        # outputs: out2d, hn, cn
        w_refs = refs[: 3 * L]
        wlin_ref, blin_ref, h0_ref, c0_ref = refs[3 * L : 3 * L + 4]
        out_ref, hn_ref, cn_ref = refs[3 * L + 4 :]

        # Lane masks (hoisted, whole-vreg): which lanes belong to the forward
        # direction, and which lanes are the tanh-activated "g" gate.
        lane = jax.lax.broadcasted_iota(jnp.int32, (B, G8), dimension=1)
        fwd_mask = (lane % TWO_H) < H
        g_mask = (lane >= 4 * H) & (lane < 6 * H)

        y2d = x_ref[...]  # (T*B, D_in) time-major rows, current layer input

        for layer in range(L):
            wih = w_refs[3 * layer][...]        # (D_in, 8H)
            whh = w_refs[3 * layer + 1][...]    # (2H, 8H) block-diag per dir
            bias = w_refs[3 * layer + 2][...]   # (1, 8H)

            # ---- hoisted input projection for the whole sequence (+ bias) ----
            z = (
                jnp.dot(y2d, wih, preferred_element_type=jnp.float32) + bias
            )  # (T*B, 8H)

            h = h0_ref[layer]  # (B, 2H) = [h_fwd | h_bwd]
            c = c0_ref[layer]  # (B, 2H)

            yf_rows = [None] * T  # forward-direction outputs, time order
            yb_rows = [None] * T  # backward-direction outputs, time order

            # ---- fused bidirectional recurrence, fully unrolled -------------
            for t in range(T):
                zf = z[t * B : (t + 1) * B, :]              # proj of x[t]
                zb = z[(T - 1 - t) * B : (T - t) * B, :]    # proj of x[T-1-t]
                pre = jnp.where(fwd_mask, zf, zb) + jnp.dot(
                    h, whh, preferred_element_type=jnp.float32
                )  # (B, 8H)
                # Whole-vreg activation, then select the tanh'd g lanes.
                act = jnp.where(g_mask, jnp.tanh(pre), jax.nn.sigmoid(pre))
                i_g = act[:, 0:TWO_H]
                f_g = act[:, TWO_H : 2 * TWO_H]
                g_g = act[:, 2 * TWO_H : 3 * TWO_H]
                o_g = act[:, 3 * TWO_H : 4 * TWO_H]
                c = f_g * c + i_g * g_g
                h = o_g * jnp.tanh(c)
                yf_rows[t] = h[:, 0:H]               # fwd output for time t
                yb_rows[T - 1 - t] = h[:, H:TWO_H]   # bwd output for time T-1-t

            # ---- final states (PyTorch layout: [..., layer_fwd, layer_bwd]) --
            hn_ref[2 * layer] = h[:, 0:H]
            hn_ref[2 * layer + 1] = h[:, H:TWO_H]
            cn_ref[2 * layer] = c[:, 0:H]
            cn_ref[2 * layer + 1] = c[:, H:TWO_H]

            # ---- assemble next layer input (T*B, 2H), time-major rows -------
            yf = jnp.concatenate(yf_rows, axis=0)  # (T*B, H)
            yb = jnp.concatenate(yb_rows, axis=0)  # (T*B, H)
            y2d = jnp.concatenate([yf, yb], axis=-1)  # (T*B, 2H)

        # ---- fused linear head ------------------------------------------------
        head = (
            jnp.dot(y2d, wlin_ref[...], preferred_element_type=jnp.float32)
            + blin_ref[...]
        )
        out_ref[...] = head.astype(out_ref.dtype)

    return kernel


# ---------------------------------------------------------------------------
# Weight fusion helpers (host side, trace-time)
# ---------------------------------------------------------------------------
def _fuse_cols(wf, wb, H):
    """Interleave two (..., 4H) gate-column blocks into (..., 8H):
    gate-major, direction-minor: [i_f, i_b, f_f, f_b, g_f, g_b, o_f, o_b]."""
    sf = wf.reshape(wf.shape[:-1] + (4, H))
    sb = wb.reshape(wb.shape[:-1] + (4, H))
    return jnp.stack([sf, sb], axis=-2).reshape(wf.shape[:-1] + (8 * H,))


def _pack_layer_weights(p_fwd, p_bwd, H):
    """Build fused (D_in, 8H) W_ih, block-diagonal (2H, 8H) W_hh, (1, 8H) bias."""
    wih = _fuse_cols(p_fwd["w_ih"].T, p_bwd["w_ih"].T, H)          # (D_in, 8H)
    z4 = jnp.zeros((H, 4 * H), jnp.float32)
    whh = jnp.concatenate(
        [_fuse_cols(p_fwd["w_hh"].T, z4, H), _fuse_cols(z4, p_bwd["w_hh"].T, H)],
        axis=0,
    )                                                              # (2H, 8H)
    bias = _fuse_cols(
        p_fwd["b_ih"] + p_fwd["b_hh"], p_bwd["b_ih"] + p_bwd["b_hh"], H
    )[None, :]                                                     # (1, 8H)
    return wih, whh, bias


# ---------------------------------------------------------------------------
# Parameter init (deterministic, mirrors PyTorch shapes & uniform init)
# ---------------------------------------------------------------------------
def init_params(key, cfg):
    H = cfg.hidden_size
    k_lstm = 1.0 / jnp.sqrt(H)
    params = {"lstm": [], "linear": {}}
    for layer in range(cfg.lstm_layers):
        in_dim = cfg.input_size if layer == 0 else 2 * H
        for _direction in range(2):
            key, k1, k2, k3, k4 = jax.random.split(key, 5)
            w_ih = jax.random.uniform(k1, (4 * H, in_dim), jnp.float32,
                                      -k_lstm, k_lstm)
            w_hh = jax.random.uniform(k2, (4 * H, H), jnp.float32,
                                      -k_lstm, k_lstm)
            b_ih = jax.random.uniform(k3, (4 * H,), jnp.float32,
                                      -k_lstm, k_lstm)
            b_hh = jax.random.uniform(k4, (4 * H,), jnp.float32,
                                      -k_lstm, k_lstm)
            params["lstm"].append(
                {"w_ih": w_ih, "w_hh": w_hh, "b_ih": b_ih, "b_hh": b_hh})
    k_lin = 1.0 / jnp.sqrt(2 * H)
    key, k1, k2 = jax.random.split(key, 3)
    params["linear"]["w"] = jax.random.uniform(
        k1, (cfg.output_size, 2 * H), jnp.float32, -k_lin, k_lin)
    params["linear"]["b"] = jax.random.uniform(
        k2, (cfg.output_size,), jnp.float32, -k_lin, k_lin)
    return params


# ---------------------------------------------------------------------------
# Forward pass (matches Net.forward: returns (linear_out, (h_n, c_n)))
# ---------------------------------------------------------------------------
def net_forward(x, params, cfg, hidden=None):
    # x: (B, T, input_size), batch_first like the PyTorch module.
    B, T, D = x.shape
    H = cfg.hidden_size
    L = cfg.lstm_layers
    O = cfg.output_size

    if hidden is None:
        h0 = jnp.zeros((2 * L, B, H), jnp.float32)
        c0 = jnp.zeros((2 * L, B, H), jnp.float32)
    else:
        h0, c0 = hidden

    # Fuse per-layer direction weights into the lane-packed layout.
    fused = []
    for layer in range(L):
        wih, whh, bias = _pack_layer_weights(
            params["lstm"][2 * layer], params["lstm"][2 * layer + 1], H)
        fused += [wih, whh, bias]

    # Pack initial states as (L, B, 2H) = [fwd | bwd] along lanes.
    h0p = jnp.concatenate([h0[0::2], h0[1::2]], axis=-1)
    c0p = jnp.concatenate([c0[0::2], c0[1::2]], axis=-1)

    # Time-major, flattened input rows: row index = t * B + b.
    x2d = jnp.transpose(x, (1, 0, 2)).reshape(T * B, D).astype(jnp.float32)

    wlin = params["linear"]["w"].T          # (2H, O)
    blin = params["linear"]["b"][None, :]   # (1, O)

    kernel = _make_net_kernel(T, B, H, L)
    vmem = pl.BlockSpec(memory_space=pltpu.MemorySpace.VMEM)
    n_in = 1 + 3 * L + 4

    out2d, h_n, c_n = pl.pallas_call(
        kernel,
        out_shape=(
            jax.ShapeDtypeStruct((T * B, O), jnp.float32),
            jax.ShapeDtypeStruct((2 * L, B, H), jnp.float32),
            jax.ShapeDtypeStruct((2 * L, B, H), jnp.float32),
        ),
        in_specs=[vmem] * n_in,
        out_specs=(vmem, vmem, vmem),
    )(x2d, *fused, wlin, blin, h0p, c0p)

    lin = out2d.reshape(T, B, O).transpose(1, 0, 2)  # (B, T, O), batch_first
    return lin, (h_n, c_n)


# ---------------------------------------------------------------------------
# Pure-JAX reference (for a structural correctness self-check)
# ---------------------------------------------------------------------------
def _reference_forward(x, params, cfg, hidden=None):
    B, T, _ = x.shape
    H = cfg.hidden_size
    L = cfg.lstm_layers
    hp = jax.lax.Precision.HIGHEST
    if hidden is None:
        h0 = jnp.zeros((2 * L, B, H), jnp.float32)
        c0 = jnp.zeros((2 * L, B, H), jnp.float32)
    else:
        h0, c0 = hidden

    layer_in = x.astype(jnp.float32)  # (B, T, D)
    h_n, c_n = [], []
    for layer in range(L):
        outs = []
        for d in range(2):
            p = params["lstm"][2 * layer + d]
            wih, whh = p["w_ih"].T, p["w_hh"].T
            b = p["b_ih"] + p["b_hh"]
            h, c = h0[2 * layer + d], c0[2 * layer + d]
            order = range(T) if d == 0 else range(T - 1, -1, -1)
            ys = [None] * T
            for t in order:
                g = (jnp.dot(layer_in[:, t], wih, precision=hp)
                     + jnp.dot(h, whh, precision=hp) + b)
                i = jax.nn.sigmoid(g[:, 0 * H:1 * H])
                f = jax.nn.sigmoid(g[:, 1 * H:2 * H])
                gg = jnp.tanh(g[:, 2 * H:3 * H])
                o = jax.nn.sigmoid(g[:, 3 * H:4 * H])
                c = f * c + i * gg
                h = o * jnp.tanh(c)
                ys[t] = h
            outs.append(jnp.stack(ys, axis=1))  # (B, T, H)
            h_n.append(h)
            c_n.append(c)
        layer_in = jnp.concatenate(outs, axis=-1)  # (B, T, 2H)
    lin = (jnp.dot(layer_in.reshape(B * T, 2 * H), params["linear"]["w"].T,
                   precision=hp) + params["linear"]["b"])
    return lin.reshape(B, T, -1), (jnp.stack(h_n, 0), jnp.stack(c_n, 0))


# ---------------------------------------------------------------------------
if __name__ == "__main__":
    cfg = SimpleNamespace(
        input_size=4,
        hidden_size=32,
        lstm_layers=2,
        dropout_rate=0.2,   # inactive in eval-mode forward
        output_size=1,
    )
    B, T = 2, 8

    key = jax.random.PRNGKey(0)
    kx, kp = jax.random.split(key)
    x = jax.random.normal(kx, (B, T, cfg.input_size), dtype=jnp.float32)
    params = init_params(kp, cfg)

    fwd = jax.jit(lambda xx, pp: net_forward(xx, pp, cfg))
    out, (h_n, c_n) = fwd(x, params)
    jax.block_until_ready((out, h_n, c_n))

    assert out.shape == (B, T, cfg.output_size)
    assert h_n.shape == (2 * cfg.lstm_layers, B, cfg.hidden_size)
    assert c_n.shape == (2 * cfg.lstm_layers, B, cfg.hidden_size)

    ref_out, (ref_h, ref_c) = _reference_forward(x, params, cfg)
    assert float(jnp.max(jnp.abs(out - ref_out))) < 1e-3
    assert float(jnp.max(jnp.abs(h_n - ref_h))) < 1e-3
    assert float(jnp.max(jnp.abs(c_n - ref_c))) < 1e-3

    print("KERNEL_OK")
</pallas_src>

<mosaic_0001>
module attributes {stable_mosaic.version = 11 : i64} {
  func.func @kernel(%arg0: memref<16x4xf32, #tpu.memory_space<vmem>>, %arg1: memref<4x256xf32, #tpu.memory_space<vmem>>, %arg2: memref<64x256xf32, #tpu.memory_space<vmem>>, %arg3: memref<1x256xf32, #tpu.memory_space<vmem>>, %arg4: memref<64x256xf32, #tpu.memory_space<vmem>>, %arg5: memref<64x256xf32, #tpu.memory_space<vmem>>, %arg6: memref<1x256xf32, #tpu.memory_space<vmem>>, %arg7: memref<64x1xf32, #tpu.memory_space<vmem>>, %arg8: memref<1x1xf32, #tpu.memory_space<vmem>>, %arg9: memref<2x2x64xf32, #tpu.memory_space<vmem>>, %arg10: memref<2x2x64xf32, #tpu.memory_space<vmem>>, %arg11: memref<16x1xf32, #tpu.memory_space<vmem>>, %arg12: memref<4x2x32xf32, #tpu.memory_space<vmem>>, %arg13: memref<4x2x32xf32, #tpu.memory_space<vmem>>) attributes {dimension_semantics = [], scalar_prefetch = 0 : i64, scratch_operands = 0 : i64, tpu.core_type = #tpu.core_type<tc>} {
    %0 = tpu.iota {dimensions = array<i32: 1>} : vector<2x256xi32>
    %c64_i32 = arith.constant 64 : i32
    %c0_i32 = arith.constant 0 : i32
    %1 = arith.cmpi eq, %c64_i32, %c0_i32 : i32
    %c1_i32 = arith.constant 1 : i32
    %2 = arith.select %1, %c1_i32, %c64_i32 : i32
    %3 = vector.broadcast %2 : i32 to vector<2x256xi32>
    %4 = arith.remsi %0, %3 : vector<2x256xi32>
    %c0_i32_0 = arith.constant 0 : i32
    %5 = vector.broadcast %c0_i32_0 : i32 to vector<2x256xi32>
    %6 = arith.cmpi ne, %4, %5 : vector<2x256xi32>
    %c0_i32_1 = arith.constant 0 : i32
    %7 = vector.broadcast %c0_i32_1 : i32 to vector<2x256xi32>
    %8 = arith.cmpi slt, %4, %7 : vector<2x256xi32>
    %c0_i32_2 = arith.constant 0 : i32
    %9 = arith.cmpi slt, %2, %c0_i32_2 : i32
    %10 = vector.broadcast %9 : i1 to vector<2x256xi1>
    %11 = vector.broadcast %10 : vector<2x256xi1> to vector<2x256xi1>
    %12 = arith.xori %8, %11 : vector<2x256xi1>
    %13 = arith.andi %12, %6 : vector<2x256xi1>
    %14 = vector.broadcast %2 : i32 to vector<2x256xi32>
    %15 = arith.addi %4, %14 : vector<2x256xi32>
    %16 = arith.select %13, %15, %4 : vector<2x256xi1>, vector<2x256xi32>
    %c32_i32 = arith.constant 32 : i32
    %17 = vector.broadcast %c32_i32 : i32 to vector<2x256xi32>
    %18 = arith.cmpi slt, %16, %17 : vector<2x256xi32>
    %c128_i32 = arith.constant 128 : i32
    %19 = vector.broadcast %c128_i32 : i32 to vector<2x256xi32>
    %20 = arith.cmpi sge, %0, %19 : vector<2x256xi32>
    %c192_i32 = arith.constant 192 : i32
    %21 = vector.broadcast %c192_i32 : i32 to vector<2x256xi32>
    %22 = arith.cmpi slt, %0, %21 : vector<2x256xi32>
    %23 = arith.andi %20, %22 : vector<2x256xi1>
    %c0 = arith.constant 0 : index
    %c0_3 = arith.constant 0 : index
    %24 = vector.load %arg0[%c0, %c0_3] : memref<16x4xf32, #tpu.memory_space<vmem>>, vector<16x4xf32>
    %c0_4 = arith.constant 0 : index
    %c0_5 = arith.constant 0 : index
    %25 = vector.load %arg1[%c0_4, %c0_5] : memref<4x256xf32, #tpu.memory_space<vmem>>, vector<4x256xf32>
    %c0_6 = arith.constant 0 : index
    %c0_7 = arith.constant 0 : index
    %26 = vector.load %arg2[%c0_6, %c0_7] : memref<64x256xf32, #tpu.memory_space<vmem>>, vector<64x256xf32>
    %c0_8 = arith.constant 0 : index
    %c0_9 = arith.constant 0 : index
    %27 = vector.load %arg3[%c0_8, %c0_9] : memref<1x256xf32, #tpu.memory_space<vmem>>, vector<1x256xf32>
    %cst = arith.constant dense<0.000000e+00> : vector<16x256xf32>
    %28 = tpu.matmul %24, %25, %cst {dimension_numbers = #tpu.dot_dimension_numbers<[1], [0], [0], [1], [0, 0, 1, 1], [], []>} : vector<16x4xf32>, vector<4x256xf32>, vector<16x256xf32> -> vector<16x256xf32>
    %29 = vector.broadcast %27 : vector<1x256xf32> to vector<16x256xf32>
    %30 = arith.addf %28, %29 : vector<16x256xf32>
    %c0_10 = arith.constant 0 : index
    %c0_11 = arith.constant 0 : index
    %c0_12 = arith.constant 0 : index
    %31 = vector.load %arg9[%c0_10, %c0_11, %c0_12] : memref<2x2x64xf32, #tpu.memory_space<vmem>>, vector<1x2x64xf32>
    %32 = vector.shape_cast %31 : vector<1x2x64xf32> to vector<2x64xf32>
    %c0_13 = arith.constant 0 : index
    %c0_14 = arith.constant 0 : index
    %c0_15 = arith.constant 0 : index
    %33 = vector.load %arg10[%c0_13, %c0_14, %c0_15] : memref<2x2x64xf32, #tpu.memory_space<vmem>>, vector<1x2x64xf32>
    %34 = vector.shape_cast %33 : vector<1x2x64xf32> to vector<2x64xf32>
    %35 = vector.extract_strided_slice %30 {offsets = [0, 0], sizes = [2, 256], strides = [1, 1]} : vector<16x256xf32> to vector<2x256xf32>
    %36 = vector.extract_strided_slice %30 {offsets = [14, 0], sizes = [2, 256], strides = [1, 1]} : vector<16x256xf32> to vector<2x256xf32>
    %37 = arith.select %18, %35, %36 : vector<2x256xi1>, vector<2x256xf32>
    %cst_16 = arith.constant dense<0.000000e+00> : vector<2x256xf32>
    %38 = tpu.matmul %32, %26, %cst_16 {dimension_numbers = #tpu.dot_dimension_numbers<[1], [0], [0], [1], [0, 0, 1, 1], [], []>} : vector<2x64xf32>, vector<64x256xf32>, vector<2x256xf32> -> vector<2x256xf32>
    %39 = arith.addf %37, %38 : vector<2x256xf32>
    %40 = math.tanh %39 : vector<2x256xf32>
    %41 = arith.negf %39 : vector<2x256xf32>
    %42 = math.exp %41 : vector<2x256xf32>
    %cst_17 = arith.constant 1.000000e+00 : f32
    %43 = vector.broadcast %cst_17 : f32 to vector<2x256xf32>
    %44 = arith.addf %43, %42 : vector<2x256xf32>
    %45 = arith.divf %43, %44 : vector<2x256xf32>
    %46 = arith.select %23, %40, %45 : vector<2x256xi1>, vector<2x256xf32>
    %47 = vector.extract_strided_slice %46 {offsets = [0, 0], sizes = [2, 64], strides = [1, 1]} : vector<2x256xf32> to vector<2x64xf32>
    %48 = vector.extract_strided_slice %46 {offsets = [0, 64], sizes = [2, 64], strides = [1, 1]} : vector<2x256xf32> to vector<2x64xf32>
    %49 = vector.extract_strided_slice %46 {offsets = [0, 128], sizes = [2, 64], strides = [1, 1]} : vector<2x256xf32> to vector<2x64xf32>
    %50 = vector.extract_strided_slice %46 {offsets = [0, 192], sizes = [2, 64], strides = [1, 1]} : vector<2x256xf32> to vector<2x64xf32>
    %51 = arith.mulf %48, %34 : vector<2x64xf32>
    %52 = arith.mulf %47, %49 : vector<2x64xf32>
    %53 = arith.addf %51, %52 : vector<2x64xf32>
    %54 = math.tanh %53 : vector<2x64xf32>
    %55 = arith.mulf %50, %54 : vector<2x64xf32>
    %56 = vector.extract_strided_slice %55 {offsets = [0, 0], sizes = [2, 32], strides = [1, 1]} : vector<2x64xf32> to vector<2x32xf32>
    %57 = vector.extract_strided_slice %55 {offsets = [0, 32], sizes = [2, 32], strides = [1, 1]} : vector<2x64xf32> to vector<2x32xf32>
    %58 = vector.extract_strided_slice %30 {offsets = [2, 0], sizes = [2, 256], strides = [1, 1]} : vector<16x256xf32> to vector<2x256xf32>
    %59 = vector.extract_strided_slice %30 {offsets = [12, 0], sizes = [2, 256], strides = [1, 1]} : vector<16x256xf32> to vector<2x256xf32>
    %60 = arith.select %18, %58, %59 : vector<2x256xi1>, vector<2x256xf32>
    %cst_18 = arith.constant dense<0.000000e+00> : vector<2x256xf32>
    %61 = tpu.matmul %55, %26, %cst_18 {dimension_numbers = #tpu.dot_dimension_numbers<[1], [0], [0], [1], [0, 0, 1, 1], [], []>} : vector<2x64xf32>, vector<64x256xf32>, vector<2x256xf32> -> vector<2x256xf32>
    %62 = arith.addf %60, %61 : vector<2x256xf32>
    %63 = math.tanh %62 : vector<2x256xf32>
    %64 = arith.negf %62 : vector<2x256xf32>
    %65 = math.exp %64 : vector<2x256xf32>
    %cst_19 = arith.constant 1.000000e+00 : f32
    %66 = vector.broadcast %cst_19 : f32 to vector<2x256xf32>
    %67 = arith.addf %66, %65 : vector<2x256xf32>
    %68 = arith.divf %66, %67 : vector<2x256xf32>
    %69 = arith.select %23, %63, %68 : vector<2x256xi1>, vector<2x256xf32>
    %70 = vector.extract_strided_slice %69 {offsets = [0, 0], sizes = [2, 64], strides = [1, 1]} : vector<2x256xf32> to vector<2x64xf32>
    %71 = vector.extract_strided_slice %69 {offsets = [0, 64], sizes = [2, 64], strides = [1, 1]} : vector<2x256xf32> to vector<2x64xf32>
    %72 = vector.extract_strided_slice %69 {offsets = [0, 128], sizes = [2, 64], strides = [1, 1]} : vector<2x256xf32> to vector<2x64xf32>
    %73 = vector.extract_strided_slice %69 {offsets = [0, 192], sizes = [2, 64], strides = [1, 1]} : vector<2x256xf32> to vector<2x64xf32>
    %74 = arith.mulf %71, %53 : vector<2x64xf32>
    %75 = arith.mulf %70, %72 : vector<2x64xf32>
    %76 = arith.addf %74, %75 : vector<2x64xf32>
    %77 = math.tanh %76 : vector<2x64xf32>
    %78 = arith.mulf %73, %77 : vector<2x64xf32>
    %79 = vector.extract_strided_slice %78 {offsets = [0, 0], sizes = [2, 32], strides = [1, 1]} : vector<2x64xf32> to vector<2x32xf32>
    %80 = vector.extract_strided_slice %78 {offsets = [0, 32], sizes = [2, 32], strides = [1, 1]} : vector<2x64xf32> to vector<2x32xf32>
    %81 = vector.extract_strided_slice %30 {offsets = [4, 0], sizes = [2, 256], strides = [1, 1]} : vector<16x256xf32> to vector<2x256xf32>
    %82 = vector.extract_strided_slice %30 {offsets = [10, 0], sizes = [2, 256], strides = [1, 1]} : vector<16x256xf32> to vector<2x256xf32>
    %83 = arith.select %18, %81, %82 : vector<2x256xi1>, vector<2x256xf32>
    %cst_20 = arith.constant dense<0.000000e+00> : vector<2x256xf32>
    %84 = tpu.matmul %78, %26, %cst_20 {dimension_numbers = #tpu.dot_dimension_numbers<[1], [0], [0], [1], [0, 0, 1, 1], [], []>} : vector<2x64xf32>, vector<64x256xf32>, vector<2x256xf32> -> vector<2x256xf32>
    %85 = arith.addf %83, %84 : vector<2x256xf32>
    %86 = math.tanh %85 : vector<2x256xf32>
    %87 = arith.negf %85 : vector<2x256xf32>
    %88 = math.exp %87 : vector<2x256xf32>
    %cst_21 = arith.constant 1.000000e+00 : f32
    %89 = vector.broadcast %cst_21 : f32 to vector<2x256xf32>
    %90 = arith.addf %89, %88 : vector<2x256xf32>
    %91 = arith.divf %89, %90 : vector<2x256xf32>
    %92 = arith.select %23, %86, %91 : vector<2x256xi1>, vector<2x256xf32>
    %93 = vector.extract_strided_slice %92 {offsets = [0, 0], sizes = [2, 64], strides = [1, 1]} : vector<2x256xf32> to vector<2x64xf32>
    %94 = vector.extract_strided_slice %92 {offsets = [0, 64], sizes = [2, 64], strides = [1, 1]} : vector<2x256xf32> to vector<2x64xf32>
    %95 = vector.extract_strided_slice %92 {offsets = [0, 128], sizes = [2, 64], strides = [1, 1]} : vector<2x256xf32> to vector<2x64xf32>
    %96 = vector.extract_strided_slice %92 {offsets = [0, 192], sizes = [2, 64], strides = [1, 1]} : vector<2x256xf32> to vector<2x64xf32>
    %97 = arith.mulf %94, %76 : vector<2x64xf32>
    %98 = arith.mulf %93, %95 : vector<2x64xf32>
    %99 = arith.addf %97, %98 : vector<2x64xf32>
    %100 = math.tanh %99 : vector<2x64xf32>
    %101 = arith.mulf %96, %100 : vector<2x64xf32>
    %102 = vector.extract_strided_slice %101 {offsets = [0, 0], sizes = [2, 32], strides = [1, 1]} : vector<2x64xf32> to vector<2x32xf32>
    %103 = vector.extract_strided_slice %101 {offsets = [0, 32], sizes = [2, 32], strides = [1, 1]} : vector<2x64xf32> to vector<2x32xf32>
    %104 = vector.extract_strided_slice %30 {offsets = [6, 0], sizes = [2, 256], strides = [1, 1]} : vector<16x256xf32> to vector<2x256xf32>
    %105 = vector.extract_strided_slice %30 {offsets = [8, 0], sizes = [2, 256], strides = [1, 1]} : vector<16x256xf32> to vector<2x256xf32>
    %106 = arith.select %18, %104, %105 : vector<2x256xi1>, vector<2x256xf32>
    %cst_22 = arith.constant dense<0.000000e+00> : vector<2x256xf32>
    %107 = tpu.matmul %101, %26, %cst_22 {dimension_numbers = #tpu.dot_dimension_numbers<[1], [0], [0], [1], [0, 0, 1, 1], [], []>} : vector<2x64xf32>, vector<64x256xf32>, vector<2x256xf32> -> vector<2x256xf32>
    %108 = arith.addf %106, %107 : vector<2x256xf32>
    %109 = math.tanh %108 : vector<2x256xf32>
    %110 = arith.negf %108 : vector<2x256xf32>
    %111 = math.exp %110 : vector<2x256xf32>
    %cst_23 = arith.constant 1.000000e+00 : f32
    %112 = vector.broadcast %cst_23 : f32 to vector<2x256xf32>
    %113 = arith.addf %112, %111 : vector<2x256xf32>
    %114 = arith.divf %112, %113 : vector<2x256xf32>
    %115 = arith.select %23, %109, %114 : vector<2x256xi1>, vector<2x256xf32>
    %116 = vector.extract_strided_slice %115 {offsets = [0, 0], sizes = [2, 64], strides = [1, 1]} : vector<2x256xf32> to vector<2x64xf32>
    %117 = vector.extract_strided_slice %115 {offsets = [0, 64], sizes = [2, 64], strides = [1, 1]} : vector<2x256xf32> to vector<2x64xf32>
    %118 = vector.extract_strided_slice %115 {offsets = [0, 128], sizes = [2, 64], strides = [1, 1]} : vector<2x256xf32> to vector<2x64xf32>
    %119 = vector.extract_strided_slice %115 {offsets = [0, 192], sizes = [2, 64], strides = [1, 1]} : vector<2x256xf32> to vector<2x64xf32>
    %120 = arith.mulf %117, %99 : vector<2x64xf32>
    %121 = arith.mulf %116, %118 : vector<2x64xf32>
    %122 = arith.addf %120, %121 : vector<2x64xf32>
    %123 = math.tanh %122 : vector<2x64xf32>
    %124 = arith.mulf %119, %123 : vector<2x64xf32>
    %125 = vector.extract_strided_slice %124 {offsets = [0, 0], sizes = [2, 32], strides = [1, 1]} : vector<2x64xf32> to vector<2x32xf32>
    %126 = vector.extract_strided_slice %124 {offsets = [0, 32], sizes = [2, 32], strides = [1, 1]} : vector<2x64xf32> to vector<2x32xf32>
    %127 = vector.extract_strided_slice %30 {offsets = [8, 0], sizes = [2, 256], strides = [1, 1]} : vector<16x256xf32> to vector<2x256xf32>
    %128 = vector.extract_strided_slice %30 {offsets = [6, 0], sizes = [2, 256], strides = [1, 1]} : vector<16x256xf32> to vector<2x256xf32>
    %129 = arith.select %18, %127, %128 : vector<2x256xi1>, vector<2x256xf32>
    %cst_24 = arith.constant dense<0.000000e+00> : vector<2x256xf32>
    %130 = tpu.matmul %124, %26, %cst_24 {dimension_numbers = #tpu.dot_dimension_numbers<[1], [0], [0], [1], [0, 0, 1, 1], [], []>} : vector<2x64xf32>, vector<64x256xf32>, vector<2x256xf32> -> vector<2x256xf32>
    %131 = arith.addf %129, %130 : vector<2x256xf32>
    %132 = math.tanh %131 : vector<2x256xf32>
    %133 = arith.negf %131 : vector<2x256xf32>
    %134 = math.exp %133 : vector<2x256xf32>
    %cst_25 = arith.constant 1.000000e+00 : f32
    %135 = vector.broadcast %cst_25 : f32 to vector<2x256xf32>
    %136 = arith.addf %135, %134 : vector<2x256xf32>
    %137 = arith.divf %135, %136 : vector<2x256xf32>
    %138 = arith.select %23, %132, %137 : vector<2x256xi1>, vector<2x256xf32>
    %139 = vector.extract_strided_slice %138 {offsets = [0, 0], sizes = [2, 64], strides = [1, 1]} : vector<2x256xf32> to vector<2x64xf32>
    %140 = vector.extract_strided_slice %138 {offsets = [0, 64], sizes = [2, 64], strides = [1, 1]} : vector<2x256xf32> to vector<2x64xf32>
    %141 = vector.extract_strided_slice %138 {offsets = [0, 128], sizes = [2, 64], strides = [1, 1]} : vector<2x256xf32> to vector<2x64xf32>
    %142 = vector.extract_strided_slice %138 {offsets = [0, 192], sizes = [2, 64], strides = [1, 1]} : vector<2x256xf32> to vector<2x64xf32>
    %143 = arith.mulf %140, %122 : vector<2x64xf32>
    %144 = arith.mulf %139, %141 : vector<2x64xf32>
    %145 = arith.addf %143, %144 : vector<2x64xf32>
    %146 = math.tanh %145 : vector<2x64xf32>
    %147 = arith.mulf %142, %146 : vector<2x64xf32>
    %148 = vector.extract_strided_slice %147 {offsets = [0, 0], sizes = [2, 32], strides = [1, 1]} : vector<2x64xf32> to vector<2x32xf32>
    %149 = vector.extract_strided_slice %147 {offsets = [0, 32], sizes = [2, 32], strides = [1, 1]} : vector<2x64xf32> to vector<2x32xf32>
    %150 = vector.extract_strided_slice %30 {offsets = [10, 0], sizes = [2, 256], strides = [1, 1]} : vector<16x256xf32> to vector<2x256xf32>
    %151 = vector.extract_strided_slice %30 {offsets = [4, 0], sizes = [2, 256], strides = [1, 1]} : vector<16x256xf32> to vector<2x256xf32>
    %152 = arith.select %18, %150, %151 : vector<2x256xi1>, vector<2x256xf32>
    %cst_26 = arith.constant dense<0.000000e+00> : vector<2x256xf32>
    %153 = tpu.matmul %147, %26, %cst_26 {dimension_numbers = #tpu.dot_dimension_numbers<[1], [0], [0], [1], [0, 0, 1, 1], [], []>} : vector<2x64xf32>, vector<64x256xf32>, vector<2x256xf32> -> vector<2x256xf32>
    %154 = arith.addf %152, %153 : vector<2x256xf32>
    %155 = math.tanh %154 : vector<2x256xf32>
    %156 = arith.negf %154 : vector<2x256xf32>
    %157 = math.exp %156 : vector<2x256xf32>
    %cst_27 = arith.constant 1.000000e+00 : f32
    %158 = vector.broadcast %cst_27 : f32 to vector<2x256xf32>
    %159 = arith.addf %158, %157 : vector<2x256xf32>
    %160 = arith.divf %158, %159 : vector<2x256xf32>
    %161 = arith.select %23, %155, %160 : vector<2x256xi1>, vector<2x256xf32>
    %162 = vector.extract_strided_slice %161 {offsets = [0, 0], sizes = [2, 64], strides = [1, 1]} : vector<2x256xf32> to vector<2x64xf32>
    %163 = vector.extract_strided_slice %161 {offsets = [0, 64], sizes = [2, 64], strides = [1, 1]} : vector<2x256xf32> to vector<2x64xf32>
    %164 = vector.extract_strided_slice %161 {offsets = [0, 128], sizes = [2, 64], strides = [1, 1]} : vector<2x256xf32> to vector<2x64xf32>
    %165 = vector.extract_strided_slice %161 {offsets = [0, 192], sizes = [2, 64], strides = [1, 1]} : vector<2x256xf32> to vector<2x64xf32>
    %166 = arith.mulf %163, %145 : vector<2x64xf32>
    %167 = arith.mulf %162, %164 : vector<2x64xf32>
    %168 = arith.addf %166, %167 : vector<2x64xf32>
    %169 = math.tanh %168 : vector<2x64xf32>
    %170 = arith.mulf %165, %169 : vector<2x64xf32>
    %171 = vector.extract_strided_slice %170 {offsets = [0, 0], sizes = [2, 32], strides = [1, 1]} : vector<2x64xf32> to vector<2x32xf32>
    %172 = vector.extract_strided_slice %170 {offsets = [0, 32], sizes = [2, 32], strides = [1, 1]} : vector<2x64xf32> to vector<2x32xf32>
    %173 = vector.extract_strided_slice %30 {offsets = [12, 0], sizes = [2, 256], strides = [1, 1]} : vector<16x256xf32> to vector<2x256xf32>
    %174 = vector.extract_strided_slice %30 {offsets = [2, 0], sizes = [2, 256], strides = [1, 1]} : vector<16x256xf32> to vector<2x256xf32>
    %175 = arith.select %18, %173, %174 : vector<2x256xi1>, vector<2x256xf32>
    %cst_28 = arith.constant dense<0.000000e+00> : vector<2x256xf32>
    %176 = tpu.matmul %170, %26, %cst_28 {dimension_numbers = #tpu.dot_dimension_numbers<[1], [0], [0], [1], [0, 0, 1, 1], [], []>} : vector<2x64xf32>, vector<64x256xf32>, vector<2x256xf32> -> vector<2x256xf32>
    %177 = arith.addf %175, %176 : vector<2x256xf32>
    %178 = math.tanh %177 : vector<2x256xf32>
    %179 = arith.negf %177 : vector<2x256xf32>
    %180 = math.exp %179 : vector<2x256xf32>
    %cst_29 = arith.constant 1.000000e+00 : f32
    %181 = vector.broadcast %cst_29 : f32 to vector<2x256xf32>
    %182 = arith.addf %181, %180 : vector<2x256xf32>
    %183 = arith.divf %181, %182 : vector<2x256xf32>
    %184 = arith.select %23, %178, %183 : vector<2x256xi1>, vector<2x256xf32>
    %185 = vector.extract_strided_slice %184 {offsets = [0, 0], sizes = [2, 64], strides = [1, 1]} : vector<2x256xf32> to vector<2x64xf32>
    %186 = vector.extract_strided_slice %184 {offsets = [0, 64], sizes = [2, 64], strides = [1, 1]} : vector<2x256xf32> to vector<2x64xf32>
    %187 = vector.extract_strided_slice %184 {offsets = [0, 128], sizes = [2, 64], strides = [1, 1]} : vector<2x256xf32> to vector<2x64xf32>
    %188 = vector.extract_strided_slice %184 {offsets = [0, 192], sizes = [2, 64], strides = [1, 1]} : vector<2x256xf32> to vector<2x64xf32>
    %189 = arith.mulf %186, %168 : vector<2x64xf32>
    %190 = arith.mulf %185, %187 : vector<2x64xf32>
    %191 = arith.addf %189, %190 : vector<2x64xf32>
    %192 = math.tanh %191 : vector<2x64xf32>
    %193 = arith.mulf %188, %192 : vector<2x64xf32>
    %194 = vector.extract_strided_slice %193 {offsets = [0, 0], sizes = [2, 32], strides = [1, 1]} : vector<2x64xf32> to vector<2x32xf32>
    %195 = vector.extract_strided_slice %193 {offsets = [0, 32], sizes = [2, 32], strides = [1, 1]} : vector<2x64xf32> to vector<2x32xf32>
    %196 = vector.extract_strided_slice %30 {offsets = [14, 0], sizes = [2, 256], strides = [1, 1]} : vector<16x256xf32> to vector<2x256xf32>
    %197 = vector.extract_strided_slice %30 {offsets = [0, 0], sizes = [2, 256], strides = [1, 1]} : vector<16x256xf32> to vector<2x256xf32>
    %198 = arith.select %18, %196, %197 : vector<2x256xi1>, vector<2x256xf32>
    %cst_30 = arith.constant dense<0.000000e+00> : vector<2x256xf32>
    %199 = tpu.matmul %193, %26, %cst_30 {dimension_numbers = #tpu.dot_dimension_numbers<[1], [0], [0], [1], [0, 0, 1, 1], [], []>} : vector<2x64xf32>, vector<64x256xf32>, vector<2x256xf32> -> vector<2x256xf32>
    %200 = arith.addf %198, %199 : vector<2x256xf32>
    %201 = math.tanh %200 : vector<2x256xf32>
    %202 = arith.negf %200 : vector<2x256xf32>
    %203 = math.exp %202 : vector<2x256xf32>
    %cst_31 = arith.constant 1.000000e+00 : f32
    %204 = vector.broadcast %cst_31 : f32 to vector<2x256xf32>
    %205 = arith.addf %204, %203 : vector<2x256xf32>
    %206 = arith.divf %204, %205 : vector<2x256xf32>
    %207 = arith.select %23, %201, %206 : vector<2x256xi1>, vector<2x256xf32>
    %208 = vector.extract_strided_slice %207 {offsets = [0, 0], sizes = [2, 64], strides = [1, 1]} : vector<2x256xf32> to vector<2x64xf32>
    %209 = vector.extract_strided_slice %207 {offsets = [0, 64], sizes = [2, 64], strides = [1, 1]} : vector<2x256xf32> to vector<2x64xf32>
    %210 = vector.extract_strided_slice %207 {offsets = [0, 128], sizes = [2, 64], strides = [1, 1]} : vector<2x256xf32> to vector<2x64xf32>
    %211 = vector.extract_strided_slice %207 {offsets = [0, 192], sizes = [2, 64], strides = [1, 1]} : vector<2x256xf32> to vector<2x64xf32>
    %212 = arith.mulf %209, %191 : vector<2x64xf32>
    %213 = arith.mulf %208, %210 : vector<2x64xf32>
    %214 = arith.addf %212, %213 : vector<2x64xf32>
    %215 = math.tanh %214 : vector<2x64xf32>
    %216 = arith.mulf %211, %215 : vector<2x64xf32>
    %217 = vector.extract_strided_slice %216 {offsets = [0, 0], sizes = [2, 32], strides = [1, 1]} : vector<2x64xf32> to vector<2x32xf32>
    %218 = vector.extract_strided_slice %216 {offsets = [0, 32], sizes = [2, 32], strides = [1, 1]} : vector<2x64xf32> to vector<2x32xf32>
    %219 = vector.extract_strided_slice %216 {offsets = [0, 0], sizes = [2, 32], strides = [1, 1]} : vector<2x64xf32> to vector<2x32xf32>
    %c0_32 = arith.constant 0 : index
    %c0_33 = arith.constant 0 : index
    %c0_34 = arith.constant 0 : index
    %220 = vector.load %arg12[%c0_32, %c0_33, %c0_34] : memref<4x2x32xf32, #tpu.memory_space<vmem>>, vector<1x2x32xf32>
    %221 = vector.shape_cast %220 : vector<1x2x32xf32> to vector<2x32xf32>
    %222 = vector.shape_cast %219 : vector<2x32xf32> to vector<1x2x32xf32>
    tpu.vector_store %arg12[%c0_32, %c0_33, %c0_34], %222 {strides = array<i32>} : memref<4x2x32xf32, #tpu.memory_space<vmem>>, vector<1x2x32xf32>,
    %223 = vector.extract_strided_slice %216 {offsets = [0, 32], sizes = [2, 32], strides = [1, 1]} : vector<2x64xf32> to vector<2x32xf32>
    %c1 = arith.constant 1 : index
    %c0_35 = arith.constant 0 : index
    %c0_36 = arith.constant 0 : index
    %224 = vector.load %arg12[%c1, %c0_35, %c0_36] : memref<4x2x32xf32, #tpu.memory_space<vmem>>, vector<1x2x32xf32>
    %225 = vector.shape_cast %224 : vector<1x2x32xf32> to vector<2x32xf32>
    %226 = vector.shape_cast %223 : vector<2x32xf32> to vector<1x2x32xf32>
    tpu.vector_store %arg12[%c1, %c0_35, %c0_36], %226 {strides = array<i32>} : memref<4x2x32xf32, #tpu.memory_space<vmem>>, vector<1x2x32xf32>,
    %227 = vector.extract_strided_slice %214 {offsets = [0, 0], sizes = [2, 32], strides = [1, 1]} : vector<2x64xf32> to vector<2x32xf32>
    %c0_37 = arith.constant 0 : index
    %c0_38 = arith.constant 0 : index
    %c0_39 = arith.constant 0 : index
    %228 = vector.load %arg13[%c0_37, %c0_38, %c0_39] : memref<4x2x32xf32, #tpu.memory_space<vmem>>, vector<1x2x32xf32>
    %229 = vector.shape_cast %228 : vector<1x2x32xf32> to vector<2x32xf32>
    %230 = vector.shape_cast %227 : vector<2x32xf32> to vector<1x2x32xf32>
    tpu.vector_store %arg13[%c0_37, %c0_38, %c0_39], %230 {strides = array<i32>} : memref<4x2x32xf32, #tpu.memory_space<vmem>>, vector<1x2x32xf32>,
    %231 = vector.extract_strided_slice %214 {offsets = [0, 32], sizes = [2, 32], strides = [1, 1]} : vector<2x64xf32> to vector<2x32xf32>
    %c1_40 = arith.constant 1 : index
    %c0_41 = arith.constant 0 : index
    %c0_42 = arith.constant 0 : index
    %232 = vector.load %arg13[%c1_40, %c0_41, %c0_42] : memref<4x2x32xf32, #tpu.memory_space<vmem>>, vector<1x2x32xf32>
    %233 = vector.shape_cast %232 : vector<1x2x32xf32> to vector<2x32xf32>
    %234 = vector.shape_cast %231 : vector<2x32xf32> to vector<1x2x32xf32>
    tpu.vector_store %arg13[%c1_40, %c0_41, %c0_42], %234 {strides = array<i32>} : memref<4x2x32xf32, #tpu.memory_space<vmem>>, vector<1x2x32xf32>,
    %235 = tpu.concatenate %56, %79, %102, %125, %148, %171, %194, %217 in 0 : vector<2x32xf32>, vector<2x32xf32>, vector<2x32xf32>, vector<2x32xf32>, vector<2x32xf32>, vector<2x32xf32>, vector<2x32xf32>, vector<2x32xf32> -> vector<16x32xf32>
    %236 = tpu.concatenate %218, %195, %172, %149, %126, %103, %80, %57 in 0 : vector<2x32xf32>, vector<2x32xf32>, vector<2x32xf32>, vector<2x32xf32>, vector<2x32xf32>, vector<2x32xf32>, vector<2x32xf32>, vector<2x32xf32> -> vector<16x32xf32>
    %237 = tpu.concatenate %235, %236 in 1 : vector<16x32xf32>, vector<16x32xf32> -> vector<16x64xf32>
    %c0_43 = arith.constant 0 : index
    %c0_44 = arith.constant 0 : index
    %238 = vector.load %arg4[%c0_43, %c0_44] : memref<64x256xf32, #tpu.memory_space<vmem>>, vector<64x256xf32>
    %c0_45 = arith.constant 0 : index
    %c0_46 = arith.constant 0 : index
    %239 = vector.load %arg5[%c0_45, %c0_46] : memref<64x256xf32, #tpu.memory_space<vmem>>, vector<64x256xf32>
    %c0_47 = arith.constant 0 : index
    %c0_48 = arith.constant 0 : index
    %240 = vector.load %arg6[%c0_47, %c0_48] : memref<1x256xf32, #tpu.memory_space<vmem>>, vector<1x256xf32>
    %cst_49 = arith.constant dense<0.000000e+00> : vector<16x256xf32>
    %241 = tpu.matmul %237, %238, %cst_49 {dimension_numbers = #tpu.dot_dimension_numbers<[1], [0], [0], [1], [0, 0, 1, 1], [], []>} : vector<16x64xf32>, vector<64x256xf32>, vector<16x256xf32> -> vector<16x256xf32>
    %242 = vector.broadcast %240 : vector<1x256xf32> to vector<16x256xf32>
    %243 = arith.addf %241, %242 : vector<16x256xf32>
    %c1_50 = arith.constant 1 : index
    %c0_51 = arith.constant 0 : index
    %c0_52 = arith.constant 0 : index
    %244 = vector.load %arg9[%c1_50, %c0_51, %c0_52] : memref<2x2x64xf32, #tpu.memory_space<vmem>>, vector<1x2x64xf32>
    %245 = vector.shape_cast %244 : vector<1x2x64xf32> to vector<2x64xf32>
    %c1_53 = arith.constant 1 : index
    %c0_54 = arith.constant 0 : index
    %c0_55 = arith.constant 0 : index
    %246 = vector.load %arg10[%c1_53, %c0_54, %c0_55] : memref<2x2x64xf32, #tpu.memory_space<vmem>>, vector<1x2x64xf32>
    %247 = vector.shape_cast %246 : vector<1x2x64xf32> to vector<2x64xf32>
    %248 = vector.extract_strided_slice %243 {offsets = [0, 0], sizes = [2, 256], strides = [1, 1]} : vector<16x256xf32> to vector<2x256xf32>
    %249 = vector.extract_strided_slice %243 {offsets = [14, 0], sizes = [2, 256], strides = [1, 1]} : vector<16x256xf32> to vector<2x256xf32>
    %250 = arith.select %18, %248, %249 : vector<2x256xi1>, vector<2x256xf32>
    %cst_56 = arith.constant dense<0.000000e+00> : vector<2x256xf32>
    %251 = tpu.matmul %245, %239, %cst_56 {dimension_numbers = #tpu.dot_dimension_numbers<[1], [0], [0], [1], [0, 0, 1, 1], [], []>} : vector<2x64xf32>, vector<64x256xf32>, vector<2x256xf32> -> vector<2x256xf32>
    %252 = arith.addf %250, %251 : vector<2x256xf32>
    %253 = math.tanh %252 : vector<2x256xf32>
    %254 = arith.negf %252 : vector<2x256xf32>
    %255 = math.exp %254 : vector<2x256xf32>
    %cst_57 = arith.constant 1.000000e+00 : f32
    %256 = vector.broadcast %cst_57 : f32 to vector<2x256xf32>
    %257 = arith.addf %256, %255 : vector<2x256xf32>
    %258 = arith.divf %256, %257 : vector<2x256xf32>
    %259 = arith.select %23, %253, %258 : vector<2x256xi1>, vector<2x256xf32>
    %260 = vector.extract_strided_slice %259 {offsets = [0, 0], sizes = [2, 64], strides = [1, 1]} : vector<2x256xf32> to vector<2x64xf32>
    %261 = vector.extract_strided_slice %259 {offsets = [0, 64], sizes = [2, 64], strides = [1, 1]} : vector<2x256xf32> to vector<2x64xf32>
    %262 = vector.extract_strided_slice %259 {offsets = [0, 128], sizes = [2, 64], strides = [1, 1]} : vector<2x256xf32> to vector<2x64xf32>
    %263 = vector.extract_strided_slice %259 {offsets = [0, 192], sizes = [2, 64], strides = [1, 1]} : vector<2x256xf32> to vector<2x64xf32>
    %264 = arith.mulf %261, %247 : vector<2x64xf32>
    %265 = arith.mulf %260, %262 : vector<2x64xf32>
    %266 = arith.addf %264, %265 : vector<2x64xf32>
    %267 = math.tanh %266 : vector<2x64xf32>
    %268 = arith.mulf %263, %267 : vector<2x64xf32>
    %269 = vector.extract_strided_slice %268 {offsets = [0, 0], sizes = [2, 32], strides = [1, 1]} : vector<2x64xf32> to vector<2x32xf32>
    %270 = vector.extract_strided_slice %268 {offsets = [0, 32], sizes = [2, 32], strides = [1, 1]} : vector<2x64xf32> to vector<2x32xf32>
    %271 = vector.extract_strided_slice %243 {offsets = [2, 0], sizes = [2, 256], strides = [1, 1]} : vector<16x256xf32> to vector<2x256xf32>
    %272 = vector.extract_strided_slice %243 {offsets = [12, 0], sizes = [2, 256], strides = [1, 1]} : vector<16x256xf32> to vector<2x256xf32>
    %273 = arith.select %18, %271, %272 : vector<2x256xi1>, vector<2x256xf32>
    %cst_58 = arith.constant dense<0.000000e+00> : vector<2x256xf32>
    %274 = tpu.matmul %268, %239, %cst_58 {dimension_numbers = #tpu.dot_dimension_numbers<[1], [0], [0], [1], [0, 0, 1, 1], [], []>} : vector<2x64xf32>, vector<64x256xf32>, vector<2x256xf32> -> vector<2x256xf32>
    %275 = arith.addf %273, %274 : vector<2x256xf32>
    %276 = math.tanh %275 : vector<2x256xf32>
    %277 = arith.negf %275 : vector<2x256xf32>
    %278 = math.exp %277 : vector<2x256xf32>
    %cst_59 = arith.constant 1.000000e+00 : f32
    %279 = vector.broadcast %cst_59 : f32 to vector<2x256xf32>
    %280 = arith.addf %279, %278 : vector<2x256xf32>
    %281 = arith.divf %279, %280 : vector<2x256xf32>
    %282 = arith.select %23, %276, %281 : vector<2x256xi1>, vector<2x256xf32>
    %283 = vector.extract_strided_slice %282 {offsets = [0, 0], sizes = [2, 64], strides = [1, 1]} : vector<2x256xf32> to vector<2x64xf32>
    %284 = vector.extract_strided_slice %282 {offsets = [0, 64], sizes = [2, 64], strides = [1, 1]} : vector<2x256xf32> to vector<2x64xf32>
    %285 = vector.extract_strided_slice %282 {offsets = [0, 128], sizes = [2, 64], strides = [1, 1]} : vector<2x256xf32> to vector<2x64xf32>
    %286 = vector.extract_strided_slice %282 {offsets = [0, 192], sizes = [2, 64], strides = [1, 1]} : vector<2x256xf32> to vector<2x64xf32>
    %287 = arith.mulf %284, %266 : vector<2x64xf32>
    %288 = arith.mulf %283, %285 : vector<2x64xf32>
    %289 = arith.addf %287, %288 : vector<2x64xf32>
    %290 = math.tanh %289 : vector<2x64xf32>
    %291 = arith.mulf %286, %290 : vector<2x64xf32>
    %292 = vector.extract_strided_slice %291 {offsets = [0, 0], sizes = [2, 32], strides = [1, 1]} : vector<2x64xf32> to vector<2x32xf32>
    %293 = vector.extract_strided_slice %291 {offsets = [0, 32], sizes = [2, 32], strides = [1, 1]} : vector<2x64xf32> to vector<2x32xf32>
    %294 = vector.extract_strided_slice %243 {offsets = [4, 0], sizes = [2, 256], strides = [1, 1]} : vector<16x256xf32> to vector<2x256xf32>
    %295 = vector.extract_strided_slice %243 {offsets = [10, 0], sizes = [2, 256], strides = [1, 1]} : vector<16x256xf32> to vector<2x256xf32>
    %296 = arith.select %18, %294, %295 : vector<2x256xi1>, vector<2x256xf32>
    %cst_60 = arith.constant dense<0.000000e+00> : vector<2x256xf32>
    %297 = tpu.matmul %291, %239, %cst_60 {dimension_numbers = #tpu.dot_dimension_numbers<[1], [0], [0], [1], [0, 0, 1, 1], [], []>} : vector<2x64xf32>, vector<64x256xf32>, vector<2x256xf32> -> vector<2x256xf32>
    %298 = arith.addf %296, %297 : vector<2x256xf32>
    %299 = math.tanh %298 : vector<2x256xf32>
    %300 = arith.negf %298 : vector<2x256xf32>
    %301 = math.exp %300 : vector<2x256xf32>
    %cst_61 = arith.constant 1.000000e+00 : f32
    %302 = vector.broadcast %cst_61 : f32 to vector<2x256xf32>
    %303 = arith.addf %302, %301 : vector<2x256xf32>
    %304 = arith.divf %302, %303 : vector<2x256xf32>
    %305 = arith.select %23, %299, %304 : vector<2x256xi1>, vector<2x256xf32>
    %306 = vector.extract_strided_slice %305 {offsets = [0, 0], sizes = [2, 64], strides = [1, 1]} : vector<2x256xf32> to vector<2x64xf32>
    %307 = vector.extract_strided_slice %305 {offsets = [0, 64], sizes = [2, 64], strides = [1, 1]} : vector<2x256xf32> to vector<2x64xf32>
    %308 = vector.extract_strided_slice %305 {offsets = [0, 128], sizes = [2, 64], strides = [1, 1]} : vector<2x256xf32> to vector<2x64xf32>
    %309 = vector.extract_strided_slice %305 {offsets = [0, 192], sizes = [2, 64], strides = [1, 1]} : vector<2x256xf32> to vector<2x64xf32>
    %310 = arith.mulf %307, %289 : vector<2x64xf32>
    %311 = arith.mulf %306, %308 : vector<2x64xf32>
    %312 = arith.addf %310, %311 : vector<2x64xf32>
    %313 = math.tanh %312 : vector<2x64xf32>
    %314 = arith.mulf %309, %313 : vector<2x64xf32>
    %315 = vector.extract_strided_slice %314 {offsets = [0, 0], sizes = [2, 32], strides = [1, 1]} : vector<2x64xf32> to vector<2x32xf32>
    %316 = vector.extract_strided_slice %314 {offsets = [0, 32], sizes = [2, 32], strides = [1, 1]} : vector<2x64xf32> to vector<2x32xf32>
    %317 = vector.extract_strided_slice %243 {offsets = [6, 0], sizes = [2, 256], strides = [1, 1]} : vector<16x256xf32> to vector<2x256xf32>
    %318 = vector.extract_strided_slice %243 {offsets = [8, 0], sizes = [2, 256], strides = [1, 1]} : vector<16x256xf32> to vector<2x256xf32>
    %319 = arith.select %18, %317, %318 : vector<2x256xi1>, vector<2x256xf32>
    %cst_62 = arith.constant dense<0.000000e+00> : vector<2x256xf32>
    %320 = tpu.matmul %314, %239, %cst_62 {dimension_numbers = #tpu.dot_dimension_numbers<[1], [0], [0], [1], [0, 0, 1, 1], [], []>} : vector<2x64xf32>, vector<64x256xf32>, vector<2x256xf32> -> vector<2x256xf32>
    %321 = arith.addf %319, %320 : vector<2x256xf32>
    %322 = math.tanh %321 : vector<2x256xf32>
    %323 = arith.negf %321 : vector<2x256xf32>
    %324 = math.exp %323 : vector<2x256xf32>
    %cst_63 = arith.constant 1.000000e+00 : f32
    %325 = vector.broadcast %cst_63 : f32 to vector<2x256xf32>
    %326 = arith.addf %325, %324 : vector<2x256xf32>
    %327 = arith.divf %325, %326 : vector<2x256xf32>
    %328 = arith.select %23, %322, %327 : vector<2x256xi1>, vector<2x256xf32>
    %329 = vector.extract_strided_slice %328 {offsets = [0, 0], sizes = [2, 64], strides = [1, 1]} : vector<2x256xf32> to vector<2x64xf32>
    %330 = vector.extract_strided_slice %328 {offsets = [0, 64], sizes = [2, 64], strides = [1, 1]} : vector<2x256xf32> to vector<2x64xf32>
    %331 = vector.extract_strided_slice %328 {offsets = [0, 128], sizes = [2, 64], strides = [1, 1]} : vector<2x256xf32> to vector<2x64xf32>
    %332 = vector.extract_strided_slice %328 {offsets = [0, 192], sizes = [2, 64], strides = [1, 1]} : vector<2x256xf32> to vector<2x64xf32>
    %333 = arith.mulf %330, %312 : vector<2x64xf32>
    %334 = arith.mulf %329, %331 : vector<2x64xf32>
    %335 = arith.addf %333, %334 : vector<2x64xf32>
    %336 = math.tanh %335 : vector<2x64xf32>
    %337 = arith.mulf %332, %336 : vector<2x64xf32>
    %338 = vector.extract_strided_slice %337 {offsets = [0, 0], sizes = [2, 32], strides = [1, 1]} : vector<2x64xf32> to vector<2x32xf32>
    %339 = vector.extract_strided_slice %337 {offsets = [0, 32], sizes = [2, 32], strides = [1, 1]} : vector<2x64xf32> to vector<2x32xf32>
    %340 = vector.extract_strided_slice %243 {offsets = [8, 0], sizes = [2, 256], strides = [1, 1]} : vector<16x256xf32> to vector<2x256xf32>
    %341 = vector.extract_strided_slice %243 {offsets = [6, 0], sizes = [2, 256], strides = [1, 1]} : vector<16x256xf32> to vector<2x256xf32>
    %342 = arith.select %18, %340, %341 : vector<2x256xi1>, vector<2x256xf32>
    %cst_64 = arith.constant dense<0.000000e+00> : vector<2x256xf32>
    %343 = tpu.matmul %337, %239, %cst_64 {dimension_numbers = #tpu.dot_dimension_numbers<[1], [0], [0], [1], [0, 0, 1, 1], [], []>} : vector<2x64xf32>, vector<64x256xf32>, vector<2x256xf32> -> vector<2x256xf32>
    %344 = arith.addf %342, %343 : vector<2x256xf32>
    %345 = math.tanh %344 : vector<2x256xf32>
    %346 = arith.negf %344 : vector<2x256xf32>
    %347 = math.exp %346 : vector<2x256xf32>
    %cst_65 = arith.constant 1.000000e+00 : f32
    %348 = vector.broadcast %cst_65 : f32 to vector<2x256xf32>
    %349 = arith.addf %348, %347 : vector<2x256xf32>
    %350 = arith.divf %348, %349 : vector<2x256xf32>
    %351 = arith.select %23, %345, %350 : vector<2x256xi1>, vector<2x256xf32>
    %352 = vector.extract_strided_slice %351 {offsets = [0, 0], sizes = [2, 64], strides = [1, 1]} : vector<2x256xf32> to vector<2x64xf32>
    %353 = vector.extract_strided_slice %351 {offsets = [0, 64], sizes = [2, 64], strides = [1, 1]} : vector<2x256xf32> to vector<2x64xf32>
    %354 = vector.extract_strided_slice %351 {offsets = [0, 128], sizes = [2, 64], strides = [1, 1]} : vector<2x256xf32> to vector<2x64xf32>
    %355 = vector.extract_strided_slice %351 {offsets = [0, 192], sizes = [2, 64], strides = [1, 1]} : vector<2x256xf32> to vector<2x64xf32>
    %356 = arith.mulf %353, %335 : vector<2x64xf32>
    %357 = arith.mulf %352, %354 : vector<2x64xf32>
    %358 = arith.addf %356, %357 : vector<2x64xf32>
    %359 = math.tanh %358 : vector<2x64xf32>
    %360 = arith.mulf %355, %359 : vector<2x64xf32>
    %361 = vector.extract_strided_slice %360 {offsets = [0, 0], sizes = [2, 32], strides = [1, 1]} : vector<2x64xf32> to vector<2x32xf32>
    %362 = vector.extract_strided_slice %360 {offsets = [0, 32], sizes = [2, 32], strides = [1, 1]} : vector<2x64xf32> to vector<2x32xf32>
    %363 = vector.extract_strided_slice %243 {offsets = [10, 0], sizes = [2, 256], strides = [1, 1]} : vector<16x256xf32> to vector<2x256xf32>
    %364 = vector.extract_strided_slice %243 {offsets = [4, 0], sizes = [2, 256], strides = [1, 1]} : vector<16x256xf32> to vector<2x256xf32>
    %365 = arith.select %18, %363, %364 : vector<2x256xi1>, vector<2x256xf32>
    %cst_66 = arith.constant dense<0.000000e+00> : vector<2x256xf32>
    %366 = tpu.matmul %360, %239, %cst_66 {dimension_numbers = #tpu.dot_dimension_numbers<[1], [0], [0], [1], [0, 0, 1, 1], [], []>} : vector<2x64xf32>, vector<64x256xf32>, vector<2x256xf32> -> vector<2x256xf32>
    %367 = arith.addf %365, %366 : vector<2x256xf32>
    %368 = math.tanh %367 : vector<2x256xf32>
    %369 = arith.negf %367 : vector<2x256xf32>
    %370 = math.exp %369 : vector<2x256xf32>
    %cst_67 = arith.constant 1.000000e+00 : f32
    %371 = vector.broadcast %cst_67 : f32 to vector<2x256xf32>
    %372 = arith.addf %371, %370 : vector<2x256xf32>
    %373 = arith.divf %371, %372 : vector<2x256xf32>
    %374 = arith.select %23, %368, %373 : vector<2x256xi1>, vector<2x256xf32>
    %375 = vector.extract_strided_slice %374 {offsets = [0, 0], sizes = [2, 64], strides = [1, 1]} : vector<2x256xf32> to vector<2x64xf32>
    %376 = vector.extract_strided_slice %374 {offsets = [0, 64], sizes = [2, 64], strides = [1, 1]} : vector<2x256xf32> to vector<2x64xf32>
    %377 = vector.extract_strided_slice %374 {offsets = [0, 128], sizes = [2, 64], strides = [1, 1]} : vector<2x256xf32> to vector<2x64xf32>
    %378 = vector.extract_strided_slice %374 {offsets = [0, 192], sizes = [2, 64], strides = [1, 1]} : vector<2x256xf32> to vector<2x64xf32>
    %379 = arith.mulf %376, %358 : vector<2x64xf32>
    %380 = arith.mulf %375, %377 : vector<2x64xf32>
    %381 = arith.addf %379, %380 : vector<2x64xf32>
    %382 = math.tanh %381 : vector<2x64xf32>
    %383 = arith.mulf %378, %382 : vector<2x64xf32>
    %384 = vector.extract_strided_slice %383 {offsets = [0, 0], sizes = [2, 32], strides = [1, 1]} : vector<2x64xf32> to vector<2x32xf32>
    %385 = vector.extract_strided_slice %383 {offsets = [0, 32], sizes = [2, 32], strides = [1, 1]} : vector<2x64xf32> to vector<2x32xf32>
    %386 = vector.extract_strided_slice %243 {offsets = [12, 0], sizes = [2, 256], strides = [1, 1]} : vector<16x256xf32> to vector<2x256xf32>
    %387 = vector.extract_strided_slice %243 {offsets = [2, 0], sizes = [2, 256], strides = [1, 1]} : vector<16x256xf32> to vector<2x256xf32>
    %388 = arith.select %18, %386, %387 : vector<2x256xi1>, vector<2x256xf32>
    %cst_68 = arith.constant dense<0.000000e+00> : vector<2x256xf32>
    %389 = tpu.matmul %383, %239, %cst_68 {dimension_numbers = #tpu.dot_dimension_numbers<[1], [0], [0], [1], [0, 0, 1, 1], [], []>} : vector<2x64xf32>, vector<64x256xf32>, vector<2x256xf32> -> vector<2x256xf32>
    %390 = arith.addf %388, %389 : vector<2x256xf32>
    %391 = math.tanh %390 : vector<2x256xf32>
    %392 = arith.negf %390 : vector<2x256xf32>
    %393 = math.exp %392 : vector<2x256xf32>
    %cst_69 = arith.constant 1.000000e+00 : f32
    %394 = vector.broadcast %cst_69 : f32 to vector<2x256xf32>
    %395 = arith.addf %394, %393 : vector<2x256xf32>
    %396 = arith.divf %394, %395 : vector<2x256xf32>
    %397 = arith.select %23, %391, %396 : vector<2x256xi1>, vector<2x256xf32>
    %398 = vector.extract_strided_slice %397 {offsets = [0, 0], sizes = [2, 64], strides = [1, 1]} : vector<2x256xf32> to vector<2x64xf32>
    %399 = vector.extract_strided_slice %397 {offsets = [0, 64], sizes = [2, 64], strides = [1, 1]} : vector<2x256xf32> to vector<2x64xf32>
    %400 = vector.extract_strided_slice %397 {offsets = [0, 128], sizes = [2, 64], strides = [1, 1]} : vector<2x256xf32> to vector<2x64xf32>
    %401 = vector.extract_strided_slice %397 {offsets = [0, 192], sizes = [2, 64], strides = [1, 1]} : vector<2x256xf32> to vector<2x64xf32>
    %402 = arith.mulf %399, %381 : vector<2x64xf32>
    %403 = arith.mulf %398, %400 : vector<2x64xf32>
    %404 = arith.addf %402, %403 : vector<2x64xf32>
    %405 = math.tanh %404 : vector<2x64xf32>
    %406 = arith.mulf %401, %405 : vector<2x64xf32>
    %407 = vector.extract_strided_slice %406 {offsets = [0, 0], sizes = [2, 32], strides = [1, 1]} : vector<2x64xf32> to vector<2x32xf32>
    %408 = vector.extract_strided_slice %406 {offsets = [0, 32], sizes = [2, 32], strides = [1, 1]} : vector<2x64xf32> to vector<2x32xf32>
    %409 = vector.extract_strided_slice %243 {offsets = [14, 0], sizes = [2, 256], strides = [1, 1]} : vector<16x256xf32> to vector<2x256xf32>
    %410 = vector.extract_strided_slice %243 {offsets = [0, 0], sizes = [2, 256], strides = [1, 1]} : vector<16x256xf32> to vector<2x256xf32>
    %411 = arith.select %18, %409, %410 : vector<2x256xi1>, vector<2x256xf32>
    %cst_70 = arith.constant dense<0.000000e+00> : vector<2x256xf32>
    %412 = tpu.matmul %406, %239, %cst_70 {dimension_numbers = #tpu.dot_dimension_numbers<[1], [0], [0], [1], [0, 0, 1, 1], [], []>} : vector<2x64xf32>, vector<64x256xf32>, vector<2x256xf32> -> vector<2x256xf32>
    %413 = arith.addf %411, %412 : vector<2x256xf32>
    %414 = math.tanh %413 : vector<2x256xf32>
    %415 = arith.negf %413 : vector<2x256xf32>
    %416 = math.exp %415 : vector<2x256xf32>
    %cst_71 = arith.constant 1.000000e+00 : f32
    %417 = vector.broadcast %cst_71 : f32 to vector<2x256xf32>
    %418 = arith.addf %417, %416 : vector<2x256xf32>
    %419 = arith.divf %417, %418 : vector<2x256xf32>
    %420 = arith.select %23, %414, %419 : vector<2x256xi1>, vector<2x256xf32>
    %421 = vector.extract_strided_slice %420 {offsets = [0, 0], sizes = [2, 64], strides = [1, 1]} : vector<2x256xf32> to vector<2x64xf32>
    %422 = vector.extract_strided_slice %420 {offsets = [0, 64], sizes = [2, 64], strides = [1, 1]} : vector<2x256xf32> to vector<2x64xf32>
    %423 = vector.extract_strided_slice %420 {offsets = [0, 128], sizes = [2, 64], strides = [1, 1]} : vector<2x256xf32> to vector<2x64xf32>
    %424 = vector.extract_strided_slice %420 {offsets = [0, 192], sizes = [2, 64], strides = [1, 1]} : vector<2x256xf32> to vector<2x64xf32>
    %425 = arith.mulf %422, %404 : vector<2x64xf32>
    %426 = arith.mulf %421, %423 : vector<2x64xf32>
    %427 = arith.addf %425, %426 : vector<2x64xf32>
    %428 = math.tanh %427 : vector<2x64xf32>
    %429 = arith.mulf %424, %428 : vector<2x64xf32>
    %430 = vector.extract_strided_slice %429 {offsets = [0, 0], sizes = [2, 32], strides = [1, 1]} : vector<2x64xf32> to vector<2x32xf32>
    %431 = vector.extract_strided_slice %429 {offsets = [0, 32], sizes = [2, 32], strides = [1, 1]} : vector<2x64xf32> to vector<2x32xf32>
    %432 = vector.extract_strided_slice %429 {offsets = [0, 0], sizes = [2, 32], strides = [1, 1]} : vector<2x64xf32> to vector<2x32xf32>
    %c2 = arith.constant 2 : index
    %c0_72 = arith.constant 0 : index
    %c0_73 = arith.constant 0 : index
    %433 = vector.load %arg12[%c2, %c0_72, %c0_73] : memref<4x2x32xf32, #tpu.memory_space<vmem>>, vector<1x2x32xf32>
    %434 = vector.shape_cast %433 : vector<1x2x32xf32> to vector<2x32xf32>
    %435 = vector.shape_cast %432 : vector<2x32xf32> to vector<1x2x32xf32>
    tpu.vector_store %arg12[%c2, %c0_72, %c0_73], %435 {strides = array<i32>} : memref<4x2x32xf32, #tpu.memory_space<vmem>>, vector<1x2x32xf32>,
    %436 = vector.extract_strided_slice %429 {offsets = [0, 32], sizes = [2, 32], strides = [1, 1]} : vector<2x64xf32> to vector<2x32xf32>
    %c3 = arith.constant 3 : index
    %c0_74 = arith.constant 0 : index
    %c0_75 = arith.constant 0 : index
    %437 = vector.load %arg12[%c3, %c0_74, %c0_75] : memref<4x2x32xf32, #tpu.memory_space<vmem>>, vector<1x2x32xf32>
    %438 = vector.shape_cast %437 : vector<1x2x32xf32> to vector<2x32xf32>
    %439 = vector.shape_cast %436 : vector<2x32xf32> to vector<1x2x32xf32>
    tpu.vector_store %arg12[%c3, %c0_74, %c0_75], %439 {strides = array<i32>} : memref<4x2x32xf32, #tpu.memory_space<vmem>>, vector<1x2x32xf32>,
    %440 = vector.extract_strided_slice %427 {offsets = [0, 0], sizes = [2, 32], strides = [1, 1]} : vector<2x64xf32> to vector<2x32xf32>
    %c2_76 = arith.constant 2 : index
    %c0_77 = arith.constant 0 : index
    %c0_78 = arith.constant 0 : index
    %441 = vector.load %arg13[%c2_76, %c0_77, %c0_78] : memref<4x2x32xf32, #tpu.memory_space<vmem>>, vector<1x2x32xf32>
    %442 = vector.shape_cast %441 : vector<1x2x32xf32> to vector<2x32xf32>
    %443 = vector.shape_cast %440 : vector<2x32xf32> to vector<1x2x32xf32>
    tpu.vector_store %arg13[%c2_76, %c0_77, %c0_78], %443 {strides = array<i32>} : memref<4x2x32xf32, #tpu.memory_space<vmem>>, vector<1x2x32xf32>,
    %444 = vector.extract_strided_slice %427 {offsets = [0, 32], sizes = [2, 32], strides = [1, 1]} : vector<2x64xf32> to vector<2x32xf32>
    %c3_79 = arith.constant 3 : index
    %c0_80 = arith.constant 0 : index
    %c0_81 = arith.constant 0 : index
    %445 = vector.load %arg13[%c3_79, %c0_80, %c0_81] : memref<4x2x32xf32, #tpu.memory_space<vmem>>, vector<1x2x32xf32>
    %446 = vector.shape_cast %445 : vector<1x2x32xf32> to vector<2x32xf32>
    %447 = vector.shape_cast %444 : vector<2x32xf32> to vector<1x2x32xf32>
    tpu.vector_store %arg13[%c3_79, %c0_80, %c0_81], %447 {strides = array<i32>} : memref<4x2x32xf32, #tpu.memory_space<vmem>>, vector<1x2x32xf32>,
    %448 = tpu.concatenate %269, %292, %315, %338, %361, %384, %407, %430 in 0 : vector<2x32xf32>, vector<2x32xf32>, vector<2x32xf32>, vector<2x32xf32>, vector<2x32xf32>, vector<2x32xf32>, vector<2x32xf32>, vector<2x32xf32> -> vector<16x32xf32>
    %449 = tpu.concatenate %431, %408, %385, %362, %339, %316, %293, %270 in 0 : vector<2x32xf32>, vector<2x32xf32>, vector<2x32xf32>, vector<2x32xf32>, vector<2x32xf32>, vector<2x32xf32>, vector<2x32xf32>, vector<2x32xf32> -> vector<16x32xf32>
    %450 = tpu.concatenate %448, %449 in 1 : vector<16x32xf32>, vector<16x32xf32> -> vector<16x64xf32>
    %c0_82 = arith.constant 0 : index
    %c0_83 = arith.constant 0 : index
    %451 = vector.load %arg7[%c0_82, %c0_83] : memref<64x1xf32, #tpu.memory_space<vmem>>, vector<64x1xf32>
    %cst_84 = arith.constant dense<0.000000e+00> : vector<16x1xf32>
    %452 = tpu.matmul %450, %451, %cst_84 {dimension_numbers = #tpu.dot_dimension_numbers<[1], [0], [0], [1], [0, 0, 1, 1], [], []>} : vector<16x64xf32>, vector<64x1xf32>, vector<16x1xf32> -> vector<16x1xf32>
    %c0_85 = arith.constant 0 : index
    %c0_86 = arith.constant 0 : index
    %453 = vector.load %arg8[%c0_85, %c0_86] : memref<1x1xf32, #tpu.memory_space<vmem>>, vector<1x1xf32>
    %454 = vector.broadcast %453 : vector<1x1xf32> to vector<16x1xf32>
    %455 = arith.addf %452, %454 : vector<16x1xf32>
    %c0_87 = arith.constant 0 : index
    %c0_88 = arith.constant 0 : index
    %456 = vector.load %arg11[%c0_87, %c0_88] : memref<16x1xf32, #tpu.memory_space<vmem>>, vector<16x1xf32>
    tpu.vector_store %arg11[%c0_87, %c0_88], %455 {strides = array<i32>} : memref<16x1xf32, #tpu.memory_space<vmem>>, vector<16x1xf32>,
    return
  }
}

</mosaic_0001>

<bundles_post_ra>
// kernel: _lambda_.1
= control target key start
LH: loop header
LB: loop body
LE: loop exit
PB: predicated region body
PF: predicated region fallthrough
CT: control target
= control target key end

     0   :  { %s3890_s0 = inlined_call_operand.vmem [shape: f32[16,4], index: 0, kind: input, shape index: {}]   ;;  %s3891_s1 = inlined_call_operand.vmem [shape: f32[4,256], index: 1, kind: input, shape index: {}]   ;;  %s3892_s2 = inlined_call_operand.vmem [shape: f32[64,256], index: 2, kind: input, shape index: {}]   ;;  %s3893_s3 = inlined_call_operand.vmem [shape: f32[1,256], index: 3, kind: input, shape index: {}]   ;;  %s3894_s4 = inlined_call_operand.vmem [shape: f32[64,256], index: 4, kind: input, shape index: {}]   ;;  %s3895_s5 = inlined_call_operand.vmem [shape: f32[64,256], index: 5, kind: input, shape index: {}]   ;;  %s3896_s6 = inlined_call_operand.vmem [shape: f32[1,256], index: 6, kind: input, shape index: {}]   ;;  %s3897_s7 = inlined_call_operand.vmem [shape: f32[64,1], index: 7, kind: input, shape index: {}]   ;;  %s3898_s8 = inlined_call_operand.<no memory space> [shape: f32[1,1], index: 8, kind: input, shape index: {}]   ;;  %s3899_s9 = inlined_call_operand.vmem [shape: f32[2,2,64], index: 9, kind: input, shape index: {}, may-alias: {9,10}]   ;;  %s3900_s10 = inlined_call_operand.vmem [shape: f32[2,2,64], index: 10, kind: input, shape index: {}, may-alias: {9,10}]   ;;  %s3901_s11 = inlined_call_operand.vmem [shape: f32[16,1], index: 11, kind: output, shape index: {0}]   ;;  %s3902_s12 = inlined_call_operand.hbm [shape: f32[4,2,32], index: 12, kind: output, shape index: {1}]   ;;  %s3903_s13 = inlined_call_operand.hbm [shape: f32[4,2,32], index: 13, kind: output, shape index: {2}]  }
   0x1   :  { %v19_v0 = vstv %s3898_s8 }
   0x2   :  { %20 = vst [vmem:[#allocation2] sm:$0x1] %v19_v0 }
   0x3   :  { %21 = vsyncpa [#allocation4], 0  ;;  %v82_v1 = vld [vmem:[%s3891_s1] sm:$0xff]  ;;  %vm120_vm0 = vcmask 1043456   ;;  %v84_v2 = vld [vmem:[%s3892_s2 + $0x8] sm:$0xff]  ;;  %v3062_v6 = vmov 0.0  }
   0x4   :  { %v86_v3 = vld [vmem:[%s3892_s2 + $0x18] sm:$0xff]  ;;  %v112_v4 = vcombine.high %v82_v1, %v82_v1  ;;  %189 = vmatprep.mubr.f32.mxu0 %v3062_v6  ;;  %v83_v7 = vld [vmem:[%s3892_s2] sm:$0xff]  ;;  %v85_v8 = vld [vmem:[%s3892_s2 + $0x10] sm:$0xff]  ;;  %280 = vmatprep.mubr.f32.mxu1 %v3062_v6  ;;  %vm113_vm1 = vcmask 31744   ;;  %s3063_s24 = smov 64  }
   0x5   :  { %v3150_v5 = vpack.c.bf16 %v86_v3, %v84_v2  ;;  %v80_v9 = vld [vmem:[%s3890_s0] sm:$0xff]  ;;  %v3163_v10 = vpack.c.bf16 %v85_v8, %v83_v7  ;;  %v88_v11 = vld [vmem:[%s3892_s2 + $0x28] sm:$0xff]  ;;  %v90_v12 = vld [vmem:[%s3892_s2 + $0x38] sm:$0xff] }
   0x6   :  { %v87_v13 = vld [vmem:[%s3892_s2 + $0x20] sm:$0xff]  ;;  %2439 = vmatprep.subr.msk.mxu0 %vm120_vm0, %v112_v4  ;;  %v3176_v14 = vpack.c.bf16 %v90_v12, %v88_v11  ;;  %v89_v15 = vld [vmem:[%s3892_s2 + $0x30] sm:$0xff]  ;;  %v92_v16 = vld [vmem:[%s3892_s2 + $0x48] sm:$0xff] }
   0x7   :  { %2528 = vmatprep.subr.bf16.mxu1 %v3150_v5  ;;  %2440 = vmatpush1.msk.msra.mxu0 %vm120_vm0, %v82_v1  ;;  %v3186_v17 = vpack.c.bf16 %v89_v15, %v87_v13  ;;  %v94_v18 = vld [vmem:[%s3892_s2 + $0x58] sm:$0xff]  ;;  %v81_v19 = vld [vmem:[%s3890_s0 + $0x8] sm:$0xff]  ;;  %v91_v21 = vld [vmem:[%s3892_s2 + $0x40] sm:$0xff] }
   0x8   :  { %2530 = vmatpush1.bf16.msra.mxu1 %v3163_v10  ;;  %2441 = vmatmul.mubr.msk.f32.vlgmr.msra.gmra.mrb[0].mxu0 %vm113_vm1, %v80_v9  ;;  %v3196_v20 = vpack.c.bf16 %v94_v18, %v92_v16  ;;  %v93_v22 = vld [vmem:[%s3892_s2 + $0x50] sm:$0xff]  ;;  %v96_v23 = vld [vmem:[%s3892_s2 + $0x68] sm:$0xff]  ;;  %v98_v24 = vld [vmem:[%s3892_s2 + $0x78] sm:$0xff] }
   0x9   :  { %2532 = vmatprep.subr.bf16.mxu1 %v3176_v14  ;;  %195 = vmatprep.mubr.f32.mxu0 %v3062_v6  ;;  %v203_v25 = vld [vmem:[%s3900_s10] sm:$0x3] }
   0xa   :  { %2544 = vmatprep.subr.bf16.mxu0 %v3150_v5  ;;  %306 = vrot.lane.b32.xlu0 %v203_v25, %s3063_s24 }
   0xb   :  { %2546 = vmatpush1.bf16.msra.mxu0 %v3163_v10 }
   0xc   :  { %22 = vsyncpa [#allocation6], 0  ;;  %2534 = vmatpush1.bf16.msra.mxu1 %v3186_v17  ;;  %v3218_v26 = vpack.c.bf16 %v93_v22, %v91_v21  ;;  %2548 = vmatprep.subr.bf16.mxu0 %v3176_v14  ;;  %v3223_v27 = vpack.c.bf16 %v98_v24, %v96_v23  ;;  %v95_v28 = vld [vmem:[%s3892_s2 + $0x60] sm:$0xff]  ;;  %v97_v29 = vld [vmem:[%s3892_s2 + $0x70] sm:$0xff]  ;;  %vm212_vm2 = vcmask 523264   ;;  %v45_v32 = vlaneseq  ;;  %s3066_s30 = smov [#allocation5]  }
   0xd   :  { %2442 = vmatmul.mubr.msk.f32.gmra.mrb[2].mxu0 %vm113_vm1, %v81_v19  ;;  %2536 = vmatprep.subr.bf16.mxu1 %v3196_v20  ;;  %v3234_v30 = vpack.c.bf16 %v97_v29, %v95_v28  ;;  %v202_v31 = vld [vmem:[%s3899_s9] sm:$0x3]  ;;  %vm1142_vm6 = vcmask 1041408   ;;  %vm1145_vm7 = vcmask 1045504   ;;  %vm1187_vm8 = vcmask 261120   ;;  %s2422_s2 = sshll.u32 %s3066_s30, 4  ;;  %s2423_s2 = int_to_ptr.vmem [resolvable:$true] %s2422_s2 }
   0xe   :  { %393 = vmatprep.mubr.f32.mxu0 %v3062_v6  ;;  %v3257_v33 = vshrl.u32 %v45_v32, 7  ;;  %v46_v34 = vand.u32 127, %v45_v32  ;;  %v99_v36 = vld [vmem:[%s3893_s3] sm:$0x3]  ;;  %vm1125_vm9 = vcmask 261126  }
   0xf   :  { %2550 = vmatpush1.bf16.msra.mxu0 %v3186_v17 }
  0x10   :  { %2538 = vmatpush1.bf16.msra.mxu1 %v3218_v26  ;;  %2552 = vmatprep.subr.bf16.mxu0 %v3196_v20  ;;  %v103_v35 = vsub.s32 0, %v3257_v33  ;;  %v107_v37 = vsub.s32 1, %v3257_v33  ;;  %v3264_v38 = vadd.s32 128, %v46_v34  ;;  %v52_v41 = vand.u32 63, %v46_v34 }
  0x11   :  { %2540 = vmatprep.subr.bf16.mxu1 %v3223_v27 }
  0x12   :  { %v104_v39 = vrot.slane %v99_v36, %v103_v35  ;;  %v108_v40 = vrot.slane %v99_v36, %v107_v37  ;;  %v59_v43 = vand.u32 63, %v3264_v38  ;;  %vm3271_vm3 = vcmp.lt.s32.totalorder %v52_v41, 32 }
  0x13   :  { %2554 = vmatpush1.bf16.msra.mxu0 %v3218_v26  ;;  %vm77_vm5 = vcmp.lt.s32.totalorder %v3264_v38, 192  ;;  %v2307_v38 = vld [vmem:[%s3897_s7 + $0x18] sm:$0xff] }
  0x14   :  { %2542 = vmatpush1.bf16.msra.mxu1 %v3234_v30  ;;  %2556 = vmatprep.subr.bf16.mxu0 %v3223_v27  ;;  %vm3275_vm4 = vcmp.lt.s32.totalorder %v59_v43, 32 }
  0x15   :  { %2560 = vmatprep.subr.bf16.mxu1 %v3150_v5 }
  0x17   :  { %2443 = vmatmul.mubr.msk.f32.vlgmr.msra.gmra.mrb[0].mxu1 %vm212_vm2, %v202_v31  ;;  %2558 = vmatpush1.bf16.msra.mxu0 %v3234_v30 }
  0x18   :  { %2562 = vmatpush1.bf16.msra.mxu1 %v3163_v10  ;;  %506 = vmatprep.mubr.f32.mxu1 %v3062_v6 }
  0x19   :  { %2564 = vmatprep.subr.bf16.mxu1 %v3176_v14  ;;  %2576 = vmatprep.subr.bf16.mxu0 %v3150_v5 }
  0x1c   :  { %2566 = vmatpush1.bf16.msra.mxu1 %v3186_v17 }
  0x1d   :  { %2568 = vmatprep.subr.bf16.mxu1 %v3196_v20 }
  0x20   :  { %2570 = vmatpush1.bf16.msra.mxu1 %v3218_v26 }
  0x21   :  { %2572 = vmatprep.subr.bf16.mxu1 %v3223_v27 }
  0x24   :  { %2574 = vmatpush1.bf16.msra.mxu1 %v3234_v30 }
  0x25   :  { %2592 = vmatprep.subr.bf16.mxu1 %v3150_v5 }
  0x7c   :  { %v307_v28 = vpop.permute.xlu0 %306 }
  0xdb   :  { %v191_v42 = vpop.f32.mrb[0].mxu0 }
  0xdc   :  { %v192_v44 = vadd.f32 %v191_v42, %v104_v39  ;;  %v193_v45 = vpop.f32.mrb[1].mxu0 }
  0xdd   :  { %v194_v46 = vadd.f32 %v193_v45, %v108_v40 }
  0xde   :  { %v664_v47 = vrot.slane %v192_v44, 6  ;;  %v777_v48 = vrot.slane %v192_v44, 2 }
  0xdf   :  { %v665_v51 = vrot.slane %v194_v46, 6  ;;  %v778_v52 = vrot.slane %v194_v46, 2 }
  0xe0   :  { %v197_v50 = vpop.f32.mrb[2].mxu0 }
  0xe1   :  { %v198_v54 = vadd.f32 %v197_v50, %v104_v39  ;;  %v199_v55 = vpop.f32.mrb[3].mxu0 }
  0xe2   :  { %v200_v56 = vadd.f32 %v199_v55, %v108_v40 }
  0xe3   :  { %v206_v57 = vrot.slane %v198_v54, 6  ;;  %v318_v58 = vrot.slane %v198_v54, 2  ;;  %v3281_v59 = vsel %vm3271_vm3, %v198_v54, %v664_v47  ;;  %v3285_v60 = vsel %vm3271_vm3, %v198_v54, %v777_v48 }
  0xe4   :  { %v207_v61 = vrot.slane %v200_v56, 6  ;;  %v319_v62 = vrot.slane %v200_v56, 2  ;;  %v3289_v63 = vsel %vm3275_vm4, %v200_v56, %v665_v51  ;;  %v3293_v0 = vsel %vm3275_vm4, %v200_v56, %v778_v52 }
  0xe5   :  { %v3297_v1 = vsel %vm3271_vm3, %v192_v44, %v206_v57  ;;  %v3301_v2 = vsel %vm3271_vm3, %v192_v44, %v318_v58 }
  0xe6   :  { %v3305_v3 = vsel %vm3275_vm4, %v194_v46, %v207_v61  ;;  %v3309_v4 = vsel %vm3275_vm4, %v194_v46, %v319_v62 }
  0xea   :  { %v282_v7 = vpop.f32.mrb[0].mxu1 }
  0xeb   :  { %v287_v8 = vadd.f32 %v282_v7, %v3297_v1  ;;  %v284_v9 = vpop.f32.mrb[1].mxu1 }
  0xec   :  { %v288_v11 = vadd.f32 %v284_v9, %v3305_v3 }
  0xed   :  { %v2444_v12 = vmul.f32 -1.442695, %v287_v8 }
  0xee   :  { %v2445_v13 = vmul.f32 -1.442695, %v288_v11 }
  0xef   :  { %2822 = vpow2.f32 %v2444_v12 }
  0xf0   :  { %2824 = vpow2.f32 %v2445_v13 }
  0xf1   :  { %2826 = vtanh.f32 %v288_v11 }
  0xf9   :  { %v2823_v15 = vpop.eup %2822 }
  0xfa   :  { %v2825_v16 = vpop.eup %2824  ;;  %v297_v18 = vadd.f32 1.0, %v2823_v15 }
  0xfb   :  { %v298_v19 = vadd.f32 1.0, %v2825_v16  ;;  %v2827_v21 = vpop.eup %2826 }
  0xfd   :  { %2828 = vrcp.f32 %v298_v19 }
  0xfe   :  { %2830 = vrcp.f32 %v297_v18 }
 0x107   :  { %v2829_v22 = vpop.eup %2828 }
 0x108   :  { %v2831_v23 = vpop.eup %2830  ;;  %v304_v24 = vsel %vm77_vm5, %v2827_v21, %v2829_v22 }
 0x109   :  { %v310_v25 = vmul.f32 %v2831_v23, %v304_v24  ;;  %v309_v29 = vmul.f32 %v2831_v23, %v307_v28 }
 0x10b   :  { %312 = vrot.lane.b32.xlu0 %v310_v25, %s3063_s24 }
 0x17d   :  { %v313_v31 = vpop.permute.xlu0 %312 }
 0x17e   :  { %v315_v32 = vadd.f32 %v313_v31, %v309_v29 }
 0x180   :  { %2832 = vtanh.f32 %v315_v32  ;;  %v425_v55 = vrot.slane %v315_v32, 6 }
 0x18a   :  { %v2833_v34 = vpop.eup %2832 }
 0x18b   :  { %v3317_v36 = vmul.f32 %v2833_v34, %v304_v24 }
 0x18d   :  { %325 = vrot.lane.b32.xlu1 %v3317_v36, %s3063_s24 }
 0x1ff   :  { %v326_v39 = vpop.permute.xlu1 %325 }
 0x200   :  { %2446 = vmatmul.mubr.msk.f32.vlgmr.msra.gmra.mrb[4].mxu0 %vm212_vm2, %v326_v39 }
 0x201   :  { %2578 = vmatpush1.bf16.msra.mxu0 %v3163_v10  ;;  %619 = vmatprep.mubr.f32.mxu0 %v3062_v6 }
 0x202   :  { %2580 = vmatprep.subr.bf16.mxu0 %v3176_v14 }
 0x205   :  { %2582 = vmatpush1.bf16.msra.mxu0 %v3186_v17 }
 0x206   :  { %2584 = vmatprep.subr.bf16.mxu0 %v3196_v20 }
 0x209   :  { %2586 = vmatpush1.bf16.msra.mxu0 %v3218_v26 }
 0x20a   :  { %2588 = vmatprep.subr.bf16.mxu0 %v3223_v27 }
 0x20d   :  { %2590 = vmatpush1.bf16.msra.mxu0 %v3234_v30 }
 0x20e   :  { %2608 = vmatprep.subr.bf16.mxu0 %v3150_v5 }
 0x2d3   :  { %v395_v40 = vpop.f32.mrb[4].mxu0 }
 0x2d4   :  { %v402_v41 = vrot.slane %v395_v40, 6  ;;  %v397_v42 = vpop.f32.mrb[5].mxu0 }
 0x2d5   :  { %v403_v43 = vrot.slane %v397_v42, 6 }
 0x2d6   :  { %v406_v44 = vadd.f32 %v402_v41, %v3301_v2 }
 0x2d7   :  { %v407_v45 = vadd.f32 %v403_v43, %v3309_v4 }
 0x2d8   :  { %v2447_v46 = vmul.f32 -1.442695, %v406_v44 }
 0x2d9   :  { %v2448_v47 = vmul.f32 -1.442695, %v407_v45 }
 0x2da   :  { %2834 = vpow2.f32 %v2447_v46 }
 0x2db   :  { %2836 = vpow2.f32 %v2448_v47 }
 0x2dc   :  { %2838 = vtanh.f32 %v407_v45 }
 0x2e4   :  { %v2835_v48 = vpop.eup %2834 }
 0x2e5   :  { %v2837_v50 = vpop.eup %2836  ;;  %v416_v51 = vadd.f32 1.0, %v2835_v48 }
 0x2e6   :  { %v417_v52 = vadd.f32 1.0, %v2837_v50  ;;  %v2839_v54 = vpop.eup %2838 }
 0x2e7   :  { %2840 = vrcp.f32 %v416_v51 }
 0x2e8   :  { %2842 = vrcp.f32 %v417_v52 }
 0x2f1   :  { %v2841_v56 = vpop.eup %2840 }
 0x2f2   :  { %v2843_v57 = vpop.eup %2842  ;;  %v427_v58 = vmul.f32 %v2841_v56, %v425_v55 }
 0x2f3   :  { %v423_v61 = vsel %vm77_vm5, %v2839_v54, %v2843_v57 }
 0x2f4   :  { %v428_v62 = vmul.f32 %v2841_v56, %v423_v61 }
 0x2f6   :  { %430 = vrot.lane.b32.xlu1 %v428_v62, %s3063_s24 }
 0x368   :  { %v431_v7 = vpop.permute.xlu1 %430 }
 0x369   :  { %v433_v8 = vadd.f32 %v431_v7, %v427_v58 }
 0x36b   :  { %2844 = vtanh.f32 %v433_v8  ;;  %v538_v34 = vrot.slane %v433_v8, 6 }
 0x375   :  { %v2845_v9 = vpop.eup %2844 }
 0x376   :  { %v3336_v11 = vmul.f32 %v2845_v9, %v423_v61 }
 0x378   :  { %v437_v12 = vrot.slane %v3336_v11, 2  ;;  %v1143_v46 = vsel %vm1142_vm6, %v3317_v36, %v3336_v11 }
 0x37a   :  { %438 = vrot.lane.b32.xlu0 %v437_v12, %s3063_s24 }
 0x3ec   :  { %v439_v13 = vpop.permute.xlu0 %438 }
 0x3ed   :  { %2449 = vmatmul.mubr.msk.f32.vlgmr.msra.gmra.mrb[2].mxu1 %vm212_vm2, %v439_v13 }
 0x3ee   :  { %2594 = vmatpush1.bf16.msra.mxu1 %v3163_v10  ;;  %740 = vmatprep.mubr.f32.mxu1 %v3062_v6 }
 0x3ef   :  { %2596 = vmatprep.subr.bf16.mxu1 %v3176_v14 }
 0x3f2   :  { %2598 = vmatpush1.bf16.msra.mxu1 %v3186_v17 }
 0x3f3   :  { %2600 = vmatprep.subr.bf16.mxu1 %v3196_v20 }
 0x3f6   :  { %2602 = vmatpush1.bf16.msra.mxu1 %v3218_v26 }
 0x3f7   :  { %2604 = vmatprep.subr.bf16.mxu1 %v3223_v27 }
 0x3fa   :  { %2606 = vmatpush1.bf16.msra.mxu1 %v3234_v30 }
 0x3fb   :  { %2624 = vmatprep.subr.bf16.mxu1 %v3150_v5 }
 0x4c0   :  { %v508_v15 = vpop.f32.mrb[2].mxu1 }
 0x4c1   :  { %v515_v16 = vrot.slane %v508_v15, 4  ;;  %v510_v18 = vpop.f32.mrb[3].mxu1 }
 0x4c2   :  { %v516_v19 = vrot.slane %v510_v18, 4 }
 0x4c3   :  { %v519_v21 = vadd.f32 %v515_v16, %v3297_v1 }
 0x4c4   :  { %v520_v22 = vadd.f32 %v516_v19, %v3305_v3 }
 0x4c5   :  { %v2450_v23 = vmul.f32 -1.442695, %v519_v21 }
 0x4c6   :  { %v2451_v24 = vmul.f32 -1.442695, %v520_v22 }
 0x4c7   :  { %2846 = vpow2.f32 %v2450_v23 }
 0x4c8   :  { %2848 = vpow2.f32 %v2451_v24 }
 0x4c9   :  { %2850 = vtanh.f32 %v520_v22 }
 0x4d1   :  { %v2847_v25 = vpop.eup %2846 }
 0x4d2   :  { %v2849_v28 = vpop.eup %2848  ;;  %v529_v29 = vadd.f32 1.0, %v2847_v25 }
 0x4d3   :  { %v530_v31 = vadd.f32 1.0, %v2849_v28  ;;  %v2851_v32 = vpop.eup %2850  ;;  %v1161_v28 = vrot.slane %v3336_v11, 6 }
 0x4d4   :  { %2852 = vrcp.f32 %v529_v29 }
 0x4d5   :  { %2854 = vrcp.f32 %v530_v31 }
 0x4de   :  { %v2853_v39 = vpop.eup %2852 }
 0x4df   :  { %v2855_v40 = vpop.eup %2854  ;;  %v540_v41 = vmul.f32 %v2853_v39, %v538_v34 }
 0x4e0   :  { %v536_v1 = vsel %vm77_vm5, %v2851_v32, %v2855_v40 }
 0x4e1   :  { %v541_v3 = vmul.f32 %v2853_v39, %v536_v1 }
 0x4e3   :  { %543 = vrot.lane.b32.xlu1 %v541_v3, %s3063_s24 }
 0x555   :  { %v544_v42 = vpop.permute.xlu1 %543 }
 0x556   :  { %v546_v43 = vadd.f32 %v544_v42, %v540_v41 }
 0x558   :  { %2856 = vtanh.f32 %v546_v43  ;;  %v651_v12 = vrot.slane %v546_v43, 6 }
 0x562   :  { %v2857_v44 = vpop.eup %2856 }
 0x563   :  { %v548_v45 = vmul.f32 %v2857_v44, %v536_v1 }
 0x565   :  { %v550_v47 = vrot.slane %v548_v45, 4  ;;  %v1144_v48 = vsel %vm120_vm0, %v1143_v46, %v548_v45  ;;  %v1159_v25 = vrot.slane %v548_v45, 2 }
 0x567   :  { %551 = vrot.lane.b32.xlu0 %v550_v47, %s3063_s24 }
 0x5d9   :  { %v552_v50 = vpop.permute.xlu0 %551 }
 0x5da   :  { %2452 = vmatmul.mubr.msk.f32.vlgmr.msra.gmra.mrb[6].mxu0 %vm212_vm2, %v552_v50 }
 0x5db   :  { %2610 = vmatpush1.bf16.msra.mxu0 %v3163_v10  ;;  %852 = vmatprep.mubr.f32.mxu0 %v3062_v6 }
 0x5dc   :  { %2612 = vmatprep.subr.bf16.mxu0 %v3176_v14 }
 0x5df   :  { %2614 = vmatpush1.bf16.msra.mxu0 %v3186_v17 }
 0x5e0   :  { %2616 = vmatprep.subr.bf16.mxu0 %v3196_v20 }
 0x5e3   :  { %2618 = vmatpush1.bf16.msra.mxu0 %v3218_v26 }
 0x5e4   :  { %2620 = vmatprep.subr.bf16.mxu0 %v3223_v27 }
 0x5e7   :  { %2622 = vmatpush1.bf16.msra.mxu0 %v3234_v30 }
 0x5e8   :  { %2640 = vmatprep.subr.bf16.mxu0 %v3150_v5 }
 0x6ad   :  { %v621_v51 = vpop.f32.mrb[6].mxu0 }
 0x6ae   :  { %v628_v52 = vrot.slane %v621_v51, 2  ;;  %v623_v54 = vpop.f32.mrb[7].mxu0 }
 0x6af   :  { %v629_v55 = vrot.slane %v623_v54, 2 }
 0x6b0   :  { %v632_v56 = vadd.f32 %v628_v52, %v3301_v2 }
 0x6b1   :  { %v633_v57 = vadd.f32 %v629_v55, %v3309_v4 }
 0x6b2   :  { %v2453_v58 = vmul.f32 -1.442695, %v632_v56 }
 0x6b3   :  { %v2454_v61 = vmul.f32 -1.442695, %v633_v57 }
 0x6b4   :  { %2858 = vpow2.f32 %v2453_v58 }
 0x6b5   :  { %2860 = vpow2.f32 %v2454_v61 }
 0x6b6   :  { %2862 = vtanh.f32 %v633_v57 }
 0x6be   :  { %v2859_v62 = vpop.eup %2858 }
 0x6bf   :  { %v2861_v7 = vpop.eup %2860  ;;  %v642_v8 = vadd.f32 1.0, %v2859_v62 }
 0x6c0   :  { %v643_v9 = vadd.f32 1.0, %v2861_v7  ;;  %v2863_v5 = vpop.eup %2862 }
 0x6c1   :  { %2864 = vrcp.f32 %v642_v8 }
 0x6c2   :  { %2866 = vrcp.f32 %v643_v9 }
 0x6cb   :  { %v2865_v13 = vpop.eup %2864 }
 0x6cc   :  { %v2867_v15 = vpop.eup %2866  ;;  %v653_v16 = vmul.f32 %v2865_v13, %v651_v12 }
 0x6cd   :  { %v649_v2 = vsel %vm77_vm5, %v2863_v5, %v2867_v15 }
 0x6ce   :  { %v654_v4 = vmul.f32 %v2865_v13, %v649_v2 }
 0x6d0   :  { %656 = vrot.lane.b32.xlu1 %v654_v4, %s3063_s24 }
 0x742   :  { %v657_v18 = vpop.permute.xlu1 %656 }
 0x743   :  { %v659_v19 = vadd.f32 %v657_v18, %v653_v16 }
 0x745   :  { %2868 = vtanh.f32 %v659_v19  ;;  %v766_v46 = vrot.slane %v659_v19, 6 }
 0x74f   :  { %v2869_v21 = vpop.eup %2868 }
 0x750   :  { %v661_v22 = vmul.f32 %v2869_v21, %v649_v2 }
 0x752   :  { %v671_v23 = vrot.slane %v661_v22, 6  ;;  %v3376_v24 = vsel %vm1145_vm7, %v1144_v48, %v661_v22 }
 0x754   :  { %672 = vrot.lane.b32.xlu0 %v671_v23, %s3063_s24  ;;  %v1168_v29 = vsel %vm1142_vm6, %v671_v23, %v1159_v25 }
 0x755   :  { %v3382_v31 = vsel %vm120_vm0, %v1168_v29, %v1161_v28 }
 0x7c6   :  { %v673_v32 = vpop.permute.xlu0 %672 }
 0x7c7   :  { %2455 = vmatmul.mubr.msk.f32.vlgmr.msra.gmra.mrb[4].mxu1 %vm212_vm2, %v673_v32 }
 0x7c8   :  { %2626 = vmatpush1.bf16.msra.mxu1 %v3163_v10  ;;  %965 = vmatprep.mubr.f32.mxu1 %v3062_v6 }
 0x7c9   :  { %2628 = vmatprep.subr.bf16.mxu1 %v3176_v14 }
 0x7cc   :  { %2630 = vmatpush1.bf16.msra.mxu1 %v3186_v17 }
 0x7cd   :  { %2632 = vmatprep.subr.bf16.mxu1 %v3196_v20 }
 0x7d0   :  { %2634 = vmatpush1.bf16.msra.mxu1 %v3218_v26 }
 0x7d1   :  { %2636 = vmatprep.subr.bf16.mxu1 %v3223_v27 }
 0x7d4   :  { %2638 = vmatpush1.bf16.msra.mxu1 %v3234_v30 }
 0x89a   :  { %v742_v11 = vpop.f32.mrb[4].mxu1 }
 0x89b   :  { %v747_v34 = vadd.f32 %v742_v11, %v3281_v59  ;;  %v744_v39 = vpop.f32.mrb[5].mxu1 }
 0x89c   :  { %v748_v40 = vadd.f32 %v744_v39, %v3289_v63 }
 0x89d   :  { %v2456_v41 = vmul.f32 -1.442695, %v747_v34 }
 0x89e   :  { %v2457_v1 = vmul.f32 -1.442695, %v748_v40 }
 0x89f   :  { %2870 = vpow2.f32 %v2456_v41 }
 0x8a0   :  { %2872 = vpow2.f32 %v2457_v1 }
 0x8a1   :  { %2874 = vtanh.f32 %v748_v40 }
 0x8a9   :  { %v2871_v3 = vpop.eup %2870 }
 0x8aa   :  { %v2873_v42 = vpop.eup %2872  ;;  %v757_v43 = vadd.f32 1.0, %v2871_v3 }
 0x8ab   :  { %v758_v44 = vadd.f32 1.0, %v2873_v42  ;;  %v2875_v45 = vpop.eup %2874 }
 0x8ac   :  { %2876 = vrcp.f32 %v757_v43 }
 0x8ad   :  { %2878 = vrcp.f32 %v758_v44 }
 0x8b6   :  { %v2877_v47 = vpop.eup %2876 }
 0x8b7   :  { %v2879_v48 = vpop.eup %2878  ;;  %v768_v50 = vmul.f32 %v2877_v47, %v766_v46 }
 0x8b8   :  { %v764_v51 = vsel %vm77_vm5, %v2875_v45, %v2879_v48 }
 0x8b9   :  { %v769_v52 = vmul.f32 %v2877_v47, %v764_v51 }
 0x8bb   :  { %771 = vrot.lane.b32.xlu1 %v769_v52, %s3063_s24 }
 0x92d   :  { %v772_v54 = vpop.permute.xlu1 %771 }
 0x92e   :  { %v774_v55 = vadd.f32 %v772_v54, %v768_v50 }
 0x930   :  { %2880 = vtanh.f32 %v774_v55 }
 0x93a   :  { %v2881_v56 = vpop.eup %2880 }
 0x93b   :  { %v3398_v57 = vmul.f32 %v2881_v56, %v764_v51 }
 0x93d   :  { %784 = vrot.lane.b32.xlu0 %v3398_v57, %s3063_s24 }
 0x9af   :  { %v785_v58 = vpop.permute.xlu0 %784 }
 0x9b0   :  { %2458 = vmatmul.mubr.msk.f32.vlgmr.msra.gmra.mrb[8].mxu0 %vm212_vm2, %v785_v58 }
 0x9b1   :  { %2642 = vmatpush1.bf16.msra.mxu0 %v3163_v10  ;;  %1078 = vmatprep.mubr.f32.mxu0 %v3062_v6 }
 0x9b2   :  { %2644 = vmatprep.subr.bf16.mxu0 %v3176_v14 }
 0x9b5   :  { %2646 = vmatpush1.bf16.msra.mxu0 %v3186_v17 }
 0x9b6   :  { %2648 = vmatprep.subr.bf16.mxu0 %v3196_v20 }
 0x9b9   :  { %2650 = vmatpush1.bf16.msra.mxu0 %v3218_v26 }
 0x9ba   :  { %2652 = vmatprep.subr.bf16.mxu0 %v3223_v27 }
 0x9bd   :  { %2654 = vmatpush1.bf16.msra.mxu0 %v3234_v30  ;;  %v884_v30 = vrot.slane %v774_v55, 6 }
 0xa83   :  { %v854_v61 = vpop.f32.mrb[8].mxu0 }
 0xa84   :  { %v861_v62 = vrot.slane %v854_v61, 6  ;;  %v856_v7 = vpop.f32.mrb[9].mxu0 }
 0xa85   :  { %v862_v8 = vrot.slane %v856_v7, 6 }
 0xa86   :  { %v865_v10 = vadd.f32 %v861_v62, %v3285_v60 }
 0xa87   :  { %v866_v9 = vadd.f32 %v862_v8, %v3293_v0 }
 0xa88   :  { %v2459_v5 = vmul.f32 -1.442695, %v865_v10 }
 0xa89   :  { %v2460_v14 = vmul.f32 -1.442695, %v866_v9 }
 0xa8a   :  { %2882 = vpow2.f32 %v2459_v5 }
 0xa8b   :  { %2884 = vpow2.f32 %v2460_v14 }
 0xa8c   :  { %2886 = vtanh.f32 %v866_v9 }
 0xa94   :  { %v2883_v17 = vpop.eup %2882 }
 0xa95   :  { %v2885_v20 = vpop.eup %2884  ;;  %v875_v12 = vadd.f32 1.0, %v2883_v17 }
 0xa96   :  { %v876_v26 = vadd.f32 1.0, %v2885_v20  ;;  %v2887_v27 = vpop.eup %2886 }
 0xa97   :  { %2888 = vrcp.f32 %v875_v12 }
 0xa98   :  { %2890 = vrcp.f32 %v876_v26 }
 0xaa1   :  { %v2889_v13 = vpop.eup %2888 }
 0xaa2   :  { %v2891_v15 = vpop.eup %2890  ;;  %v886_v16 = vmul.f32 %v2889_v13, %v884_v30 }
 0xaa3   :  { %v882_v2 = vsel %vm77_vm5, %v2887_v27, %v2891_v15 }
 0xaa4   :  { %v887_v4 = vmul.f32 %v2889_v13, %v882_v2 }
 0xaa6   :  { %889 = vrot.lane.b32.xlu1 %v887_v4, %s3063_s24  ;;  %v1193_v4 = vld [vmem:[%s3894_s4 + $0x18] sm:$0xff] }
 0xb18   :  { %v890_v18 = vpop.permute.xlu1 %889 }
 0xb19   :  { %v892_v19 = vadd.f32 %v890_v18, %v886_v16  ;;  %v1190_v18 = vld [vmem:[%s3894_s4] sm:$0xff] }
 0xb1b   :  { %2892 = vtanh.f32 %v892_v19  ;;  %v997_v45 = vrot.slane %v892_v19, 6 }
 0xb25   :  { %v2893_v21 = vpop.eup %2892 }
 0xb26   :  { %v3416_v22 = vmul.f32 %v2893_v21, %v882_v2  ;;  %v1191_v2 = vld [vmem:[%s3894_s4 + $0x8] sm:$0xff]  ;;  %v1192_v21 = vld [vmem:[%s3894_s4 + $0x10] sm:$0xff] }
 0xb27   :  { %v2655_v19 = vpack.c.bf16 %v1193_v4, %v1191_v2 }
 0xb28   :  { %v896_v23 = vrot.slane %v3416_v22, 2  ;;  %v1147_v55 = vsel %vm1142_vm6, %v3398_v57, %v3416_v22 }
 0xb29   :  { %2656 = vmatprep.subr.bf16.mxu1 %v2655_v19 }
 0xb2a   :  { %897 = vrot.lane.b32.xlu0 %v896_v23, %s3063_s24  ;;  %v1195_v23 = vld [vmem:[%s3894_s4 + $0x28] sm:$0xff] }
 0xb9c   :  { %v898_v25 = vpop.permute.xlu0 %897 }
 0xb9d   :  { %2461 = vmatmul.mubr.msk.f32.vlgmr.msra.gmra.mrb[6].mxu1 %vm212_vm2, %v898_v25  ;;  %v1197_v25 = vld [vmem:[%s3894_s4 + $0x38] sm:$0xff] }
 0xb9e   :  { %1304 = vmatprep.mubr.f32.mxu1 %v3062_v6 }
 0xc70   :  { %v967_v28 = vpop.f32.mrb[6].mxu1 }
 0xc71   :  { %v974_v29 = vrot.slane %v967_v28, 4  ;;  %v969_v32 = vpop.f32.mrb[7].mxu1  ;;  %v2657_v28 = vpack.c.bf16 %v1192_v21, %v1190_v18  ;;  %v2469_v18 = vld [vmem:[%s3899_s9 + $0x2] sm:$0x3] }
 0xc72   :  { %v975_v11 = vrot.slane %v969_v32, 4  ;;  %v1194_v32 = vld [vmem:[%s3894_s4 + $0x20] sm:$0xff] }
 0xc73   :  { %v978_v34 = vadd.f32 %v974_v29, %v3281_v59  ;;  %v2659_v29 = vpack.c.bf16 %v1197_v25, %v1195_v23  ;;  %2658 = vmatpush1.bf16.msra.mxu1 %v2657_v28  ;;  %v1156_v25 = vrot.slane %v3398_v57, 2  ;;  %v1163_v57 = vrot.slane %v3317_v36, 2 }
 0xc74   :  { %v979_v39 = vadd.f32 %v975_v11, %v3289_v63  ;;  %v1196_v11 = vld [vmem:[%s3894_s4 + $0x30] sm:$0xff] }
 0xc75   :  { %v2462_v40 = vmul.f32 -1.442695, %v978_v34  ;;  %v1199_v34 = vld [vmem:[%s3894_s4 + $0x48] sm:$0xff]  ;;  %2660 = vmatprep.subr.bf16.mxu1 %v2659_v29 }
 0xc76   :  { %v2463_v41 = vmul.f32 -1.442695, %v979_v39 }
 0xc77   :  { %2894 = vpow2.f32 %v2462_v40  ;;  %v1207_v40 = vld [vmem:[%s3895_s5 + $0x8] sm:$0xff] }
 0xc78   :  { %2896 = vpow2.f32 %v2463_v41  ;;  %v1209_v41 = vld [vmem:[%s3895_s5 + $0x18] sm:$0xff] }
 0xc79   :  { %2898 = vtanh.f32 %v979_v39  ;;  %v1201_v39 = vld [vmem:[%s3894_s4 + $0x58] sm:$0xff] }
 0xc81   :  { %v2895_v1 = vpop.eup %2894 }
 0xc82   :  { %v2897_v3 = vpop.eup %2896  ;;  %v988_v42 = vadd.f32 1.0, %v2895_v1  ;;  %v2661_v1 = vpack.c.bf16 %v1196_v11, %v1194_v32 }
 0xc83   :  { %v989_v43 = vadd.f32 1.0, %v2897_v3  ;;  %v2899_v44 = vpop.eup %2898  ;;  %v3486_v3 = vpack.c.bf16 %v1209_v41, %v1207_v40 }
 0xc84   :  { %2900 = vrcp.f32 %v988_v42  ;;  %v1206_v42 = vld [vmem:[%s3895_s5] sm:$0xff]  ;;  %2662 = vmatpush1.bf16.msra.mxu1 %v2661_v1 }
 0xc85   :  { %2902 = vrcp.f32 %v989_v43  ;;  %v2663_v43 = vpack.c.bf16 %v1201_v39, %v1199_v34  ;;  %2672 = vmatprep.subr.bf16.mxu0 %v3486_v3  ;;  %v1222_v1 = vld [vmem:[%s3896_s6] sm:$0x3] }
 0xc87   :  { %2664 = vmatprep.subr.bf16.mxu1 %v2663_v43  ;;  %v1231_v43 = vrot.slane %v1222_v1, %v107_v37 }
 0xc8e   :  { %v2901_v46 = vpop.eup %2900 }
 0xc8f   :  { %v2903_v47 = vpop.eup %2902  ;;  %v999_v48 = vmul.f32 %v2901_v46, %v997_v45  ;;  %v1200_v45 = vld [vmem:[%s3894_s4 + $0x50] sm:$0xff] }
 0xc90   :  { %v995_v59 = vsel %vm77_vm5, %v2899_v44, %v2903_v47  ;;  %v1198_v44 = vld [vmem:[%s3894_s4 + $0x40] sm:$0xff] }
 0xc91   :  { %v1000_v63 = vmul.f32 %v2901_v46, %v995_v59  ;;  %v1208_v46 = vld [vmem:[%s3895_s5 + $0x10] sm:$0xff] }
 0xc92   :  { %v3501_v47 = vpack.c.bf16 %v1208_v46, %v1206_v42  ;;  %v1227_v42 = vrot.slane %v1222_v1, %v103_v35 }
 0xc93   :  { %1002 = vrot.lane.b32.xlu1 %v1000_v63, %s3063_s24 }
 0xd05   :  { %v1003_v50 = vpop.permute.xlu1 %1002 }
 0xd06   :  { %v1005_v51 = vadd.f32 %v1003_v50, %v999_v48  ;;  %v2665_v48 = vpack.c.bf16 %v1200_v45, %v1198_v44  ;;  %v1203_v50 = vld [vmem:[%s3894_s4 + $0x68] sm:$0xff] }
 0xd08   :  { %2904 = vtanh.f32 %v1005_v51  ;;  %v1110_v30 = vrot.slane %v1005_v51, 6  ;;  %2666 = vmatpush1.bf16.msra.mxu1 %v2665_v48  ;;  %v1205_v51 = vld [vmem:[%s3894_s4 + $0x78] sm:$0xff] }
 0xd12   :  { %v2905_v52 = vpop.eup %2904 }
 0xd13   :  { %v3427_v54 = vmul.f32 %v2905_v52, %v995_v59  ;;  %v1211_v52 = vld [vmem:[%s3895_s5 + $0x28] sm:$0xff] }
 0xd15   :  { %v1009_v56 = vrot.slane %v3427_v54, 4  ;;  %v3435_v58 = vsel %vm120_vm0, %v1147_v55, %v3427_v54  ;;  %v2667_v55 = vpack.c.bf16 %v1205_v51, %v1203_v50  ;;  %v1152_v23 = vrot.slane %v3427_v54, 2 }
 0xd17   :  { %1010 = vrot.lane.b32.xlu0 %v1009_v56, %s3063_s24  ;;  %v1213_v56 = vld [vmem:[%s3895_s5 + $0x38] sm:$0xff]  ;;  %2668 = vmatprep.subr.bf16.mxu1 %v2667_v55 }
 0xd1b   :  { %1173 = vrot.lane.b32.xlu0 %v3376_v24, %s3063_s24 }
 0xd89   :  { %v1011_v61 = vpop.permute.xlu0 %1010 }
 0xd8a   :  { %2464 = vmatmul.mubr.msk.f32.vlgmr.msra.gmra.mrb[10].mxu0 %vm212_vm2, %v1011_v61  ;;  %v1202_v61 = vld [vmem:[%s3894_s4 + $0x60] sm:$0xff] }
 0xd8b   :  { %1396 = vmatprep.mubr.f32.mxu0 %v3062_v6  ;;  %2674 = vmatpush1.bf16.msra.mxu0 %v3501_v47 }
 0xd8d   :  { %v1174_v32 = vpop.permute.xlu0 %1173 }
 0xe5d   :  { %v1080_v62 = vpop.f32.mrb[10].mxu0 }
 0xe5e   :  { %v1087_v7 = vrot.slane %v1080_v62, 2  ;;  %v1082_v8 = vpop.f32.mrb[11].mxu0  ;;  %v1204_v62 = vld [vmem:[%s3894_s4 + $0x70] sm:$0xff] }
 0xe5f   :  { %v1088_v10 = vrot.slane %v1082_v8, 2  ;;  %v2669_v8 = vpack.c.bf16 %v1204_v62, %v1202_v61 }
 0xe60   :  { %v1091_v9 = vadd.f32 %v1087_v7, %v3285_v60  ;;  %v3525_v7 = vpack.c.bf16 %v1213_v56, %v1211_v52 }
 0xe61   :  { %v1092_v5 = vadd.f32 %v1088_v10, %v3293_v0  ;;  %v1210_v10 = vld [vmem:[%s3895_s5 + $0x20] sm:$0xff]  ;;  %2670 = vmatpush1.bf16.msra.mxu1 %v2669_v8 }
 0xe62   :  { %v2465_v14 = vmul.f32 -1.442695, %v1091_v9  ;;  %v1212_v9 = vld [vmem:[%s3895_s5 + $0x30] sm:$0xff]  ;;  %2676 = vmatprep.subr.bf16.mxu0 %v3525_v7  ;;  %2688 = vmatprep.subr.bf16.mxu1 %v3486_v3 }
 0xe63   :  { %v2466_v17 = vmul.f32 -1.442695, %v1092_v5 }
 0xe64   :  { %2906 = vpow2.f32 %v2465_v14  ;;  %v1215_v14 = vld [vmem:[%s3895_s5 + $0x48] sm:$0xff] }
 0xe65   :  { %2908 = vpow2.f32 %v2466_v17  ;;  %v1217_v17 = vld [vmem:[%s3895_s5 + $0x58] sm:$0xff] }
 0xe66   :  { %2910 = vtanh.f32 %v1092_v5  ;;  %v3533_v5 = vpack.c.bf16 %v1212_v9, %v1210_v10 }
 0xe68   :  { %2678 = vmatpush1.bf16.msra.mxu0 %v3533_v5 }
 0xe6e   :  { %v2907_v20 = vpop.eup %2906 }
 0xe6f   :  { %v2909_v12 = vpop.eup %2908  ;;  %v1101_v24 = vadd.f32 1.0, %v2907_v20  ;;  %v3543_v20 = vpack.c.bf16 %v1217_v17, %v1215_v14 }
 0xe70   :  { %v1102_v26 = vadd.f32 1.0, %v2909_v12  ;;  %v2911_v27 = vpop.eup %2910  ;;  %v1214_v12 = vld [vmem:[%s3895_s5 + $0x40] sm:$0xff] }
 0xe71   :  { %2912 = vrcp.f32 %v1101_v24  ;;  %v1216_v24 = vld [vmem:[%s3895_s5 + $0x50] sm:$0xff]  ;;  %2680 = vmatprep.subr.bf16.mxu0 %v3543_v20 }
 0xe72   :  { %2914 = vrcp.f32 %v1102_v26  ;;  %v3552_v26 = vpack.c.bf16 %v1216_v24, %v1214_v12 }
 0xe74   :  { %2682 = vmatpush1.bf16.msra.mxu0 %v3552_v26 }
 0xe7b   :  { %v2913_v13 = vpop.eup %2912 }
 0xe7c   :  { %v2915_v15 = vpop.eup %2914  ;;  %v1112_v16 = vmul.f32 %v2913_v13, %v1110_v30  ;;  %v1221_v30 = vld [vmem:[%s3895_s5 + $0x78] sm:$0xff] }
 0xe7d   :  { %v3446_v60 = vsel %vm77_vm5, %v2911_v27, %v2915_v15  ;;  %v1219_v27 = vld [vmem:[%s3895_s5 + $0x68] sm:$0xff]  ;;  %v1218_v15 = vld [vmem:[%s3895_s5 + $0x60] sm:$0xff] }
 0xe7e   :  { %v1113_v0 = vmul.f32 %v2913_v13, %v3446_v60  ;;  %v3562_v13 = vpack.c.bf16 %v1221_v30, %v1219_v27 }
 0xe80   :  { %1115 = vrot.lane.b32.xlu1 %v1113_v0, %s3063_s24  ;;  %2684 = vmatprep.subr.bf16.mxu0 %v3562_v13 }
 0xef2   :  { %v1116_v59 = vpop.permute.xlu1 %1115 }
 0xef3   :  { %v3504_v63 = vadd.f32 %v1116_v59, %v1112_v16  ;;  %v1220_v16 = vld [vmem:[%s3895_s5 + $0x70] sm:$0xff] }
 0xef4   :  { %v3570_v0 = vpack.c.bf16 %v1220_v16, %v1218_v15 }
 0xef5   :  { %2916 = vtanh.f32 %v3504_v63 }
 0xef6   :  { %2686 = vmatpush1.bf16.msra.mxu0 %v3570_v0 }
 0xef7   :  { %2704 = vmatprep.subr.bf16.mxu0 %v3486_v3 }
 0xef9   :  { %2471 = vmatmul.mubr.msk.f32.vlgmr.msra.gmra.mrb[12].mxu0 %vm212_vm2, %v2469_v18 }
 0xefa   :  { %2706 = vmatpush1.bf16.msra.mxu0 %v3501_v47  ;;  %1622 = vmatprep.mubr.f32.mxu0 %v3062_v6 }
 0xefb   :  { %2708 = vmatprep.subr.bf16.mxu0 %v3525_v7 }
 0xefe   :  { %2710 = vmatpush1.bf16.msra.mxu0 %v3533_v5 }
 0xeff   :  { %v2917_v2 = vpop.eup %2916  ;;  %2712 = vmatprep.subr.bf16.mxu0 %v3543_v20 }
 0xf00   :  { %v3574_v4 = vmul.f32 %v2917_v2, %v3446_v60  ;;  %v1154_v60 = vrot.slane %v3416_v22, 6  ;;  %v1170_v22 = vsel %vm1145_vm7, %v3382_v31, %v1163_v57 }
 0xf02   :  { %v1149_v19 = vsel %vm1145_vm7, %v3435_v58, %v3574_v4  ;;  %v1150_v21 = vrot.slane %v3574_v4, 6  ;;  %v2470_v58 = vld [vmem:[%s3900_s10 + $0x2] sm:$0x3]  ;;  %2714 = vmatpush1.bf16.msra.mxu0 %v3552_v26 }
 0xf03   :  { %1175 = vrot.lane.b32.xlu0 %v1149_v19, %s3063_s24  ;;  %2716 = vmatprep.subr.bf16.mxu0 %v3562_v13 }
 0xf04   :  { %v1165_v28 = vsel %vm1142_vm6, %v1150_v21, %v1152_v23 }
 0xf05   :  { %v1166_v29 = vsel %vm120_vm0, %v1165_v28, %v1154_v60 }
 0xf06   :  { %v1167_v54 = vsel %vm1145_vm7, %v1166_v29, %v1156_v25  ;;  %2718 = vmatpush1.bf16.msra.mxu0 %v3570_v0 }
 0xf07   :  { %1181 = vrot.lane.b32.xlu1 %v1167_v54, %s3063_s24  ;;  %1422 = vrot.lane.b32.xlu0 %v2470_v58, %s3063_s24 }
 0xf08   :  { %2736 = vmatprep.subr.bf16.mxu0 %v3486_v3 }
 0xf0b   :  { %1183 = vrot.lane.b32.xlu1 %v1170_v22, %s3063_s24 }
 0xf75   :  { %v1176_v31 = vpop.permute.xlu0 %1175 }
 0xf79   :  { %v1182_v36 = vpop.permute.xlu1 %1181  ;;  %v1423_v29 = vpop.permute.xlu0 %1422 }
 0xf7a   :  { %v1188_v11 = vsel %vm1187_vm8, %v1174_v32, %v1182_v36 }
 0xf7b   :  { %2467 = vmatmul.mubr.msk.f32.vlgmr.msra.gmra.mrb[8].mxu1 %vm212_vm2, %v1188_v11 }
 0xf7c   :  { %1310 = vmatprep.mubr.f32.mxu1 %v3062_v6  ;;  %2690 = vmatpush1.bf16.msra.mxu1 %v3501_v47 }
 0xf7d   :  { %v1184_v34 = vpop.permute.xlu1 %1183  ;;  %2692 = vmatprep.subr.bf16.mxu1 %v3525_v7 }
 0xf7e   :  { %v1189_v39 = vsel %vm1187_vm8, %v1176_v31, %v1184_v34 }
 0xf7f   :  { %2468 = vmatmul.mubr.msk.f32.gmra.mrb[10].mxu1 %vm212_vm2, %v1189_v39 }
 0xf80   :  { %2694 = vmatpush1.bf16.msra.mxu1 %v3533_v5  ;;  %1509 = vmatprep.mubr.f32.mxu1 %v3062_v6 }
 0xf81   :  { %2696 = vmatprep.subr.bf16.mxu1 %v3543_v20 }
 0xf84   :  { %2698 = vmatpush1.bf16.msra.mxu1 %v3552_v26 }
 0xf85   :  { %2700 = vmatprep.subr.bf16.mxu1 %v3562_v13 }
 0xf88   :  { %2702 = vmatpush1.bf16.msra.mxu1 %v3570_v0 }
 0xf89   :  { %2720 = vmatprep.subr.bf16.mxu1 %v3486_v3 }
 0xfcc   :  { %v1398_v40 = vpop.f32.mrb[12].mxu0 }
 0xfcd   :  { %v1400_v41 = vpop.f32.mrb[13].mxu0 }
0x104e   :  { %v1306_v44 = vpop.f32.mrb[8].mxu1 }
0x104f   :  { %v1307_v45 = vadd.f32 %v1306_v44, %v1227_v42  ;;  %v1308_v46 = vpop.f32.mrb[9].mxu1 }
0x1050   :  { %v1309_v48 = vadd.f32 %v1308_v46, %v1231_v43 }
0x1051   :  { %v1780_v52 = vrot.slane %v1307_v45, 6  ;;  %v1893_v55 = vrot.slane %v1307_v45, 2 }
0x1052   :  { %v1312_v59 = vpop.f32.mrb[10].mxu1  ;;  %v1781_v61 = vrot.slane %v1309_v48, 6  ;;  %v1894_v62 = vrot.slane %v1309_v48, 2 }
0x1053   :  { %v1313_v50 = vadd.f32 %v1312_v59, %v1227_v42  ;;  %v1314_v51 = vpop.f32.mrb[11].mxu1 }
0x1054   :  { %v1315_v56 = vadd.f32 %v1314_v51, %v1231_v43 }
0x1055   :  { %v1323_v8 = vrot.slane %v1313_v50, 6  ;;  %v1434_v10 = vrot.slane %v1313_v50, 2  ;;  %v3634_v35 = vsel %vm3271_vm3, %v1313_v50, %v1780_v52  ;;  %v3638_v33 = vsel %vm3271_vm3, %v1313_v50, %v1893_v55 }
0x1056   :  { %v1324_v37 = vrot.slane %v1315_v56, 6  ;;  %v1435_v9 = vrot.slane %v1315_v56, 2  ;;  %v3642_v14 = vsel %vm3275_vm4, %v1315_v56, %v1781_v61  ;;  %v3646_v17 = vsel %vm3275_vm4, %v1315_v56, %v1894_v62 }
0x1057   :  { %v3650_v12 = vsel %vm3271_vm3, %v1307_v45, %v1323_v8  ;;  %v3654_v24 = vsel %vm3271_vm3, %v1307_v45, %v1434_v10 }
0x1058   :  { %v1403_v27 = vadd.f32 %v1398_v40, %v3650_v12  ;;  %v3659_v30 = vsel %vm3275_vm4, %v1309_v48, %v1324_v37  ;;  %v3663_v15 = vsel %vm3275_vm4, %v1309_v48, %v1435_v9 }
0x1059   :  { %v1404_v16 = vadd.f32 %v1400_v41, %v3659_v30 }
0x105a   :  { %v2472_v2 = vmul.f32 -1.442695, %v1403_v27 }
0x105b   :  { %v2473_v18 = vmul.f32 -1.442695, %v1404_v16 }
0x105c   :  { %2918 = vpow2.f32 %v2472_v2 }
0x105d   :  { %2920 = vpow2.f32 %v2473_v18 }
0x105e   :  { %2922 = vtanh.f32 %v1404_v16 }
0x1066   :  { %v2919_v19 = vpop.eup %2918 }
0x1067   :  { %v2921_v49 = vpop.eup %2920  ;;  %v1413_v21 = vadd.f32 1.0, %v2919_v19 }
0x1068   :  { %v1414_v23 = vadd.f32 1.0, %v2921_v49  ;;  %v2923_v60 = vpop.eup %2922 }
0x106a   :  { %2924 = vrcp.f32 %v1414_v23 }
0x106b   :  { %2926 = vrcp.f32 %v1413_v21 }
0x1074   :  { %v2925_v25 = vpop.eup %2924 }
0x1075   :  { %v2927_v28 = vpop.eup %2926  ;;  %v1420_v53 = vsel %vm77_vm5, %v2923_v60, %v2925_v25 }
0x1076   :  { %v1426_v58 = vmul.f32 %v2927_v28, %v1420_v53  ;;  %v1425_v54 = vmul.f32 %v2927_v28, %v1423_v29 }
0x1078   :  { %1428 = vrot.lane.b32.xlu1 %v1426_v58, %s3063_s24 }
0x10ea   :  { %v1429_v57 = vpop.permute.xlu1 %1428 }
0x10eb   :  { %v1431_v22 = vadd.f32 %v1429_v57, %v1425_v54 }
0x10ed   :  { %2928 = vtanh.f32 %v1431_v22  ;;  %v1541_v50 = vrot.slane %v1431_v22, 6 }
0x10f7   :  { %v2929_v32 = vpop.eup %2928 }
0x10f8   :  { %v3669_v36 = vmul.f32 %v2929_v32, %v1420_v53 }
0x10fa   :  { %1441 = vrot.lane.b32.xlu0 %v3669_v36, %s3063_s24 }
0x116c   :  { %v1442_v11 = vpop.permute.xlu0 %1441 }
0x116d   :  { %2474 = vmatmul.mubr.msk.f32.vlgmr.msra.gmra.mrb[12].mxu1 %vm212_vm2, %v1442_v11 }
0x116e   :  { %2722 = vmatpush1.bf16.msra.mxu1 %v3501_v47  ;;  %1735 = vmatprep.mubr.f32.mxu1 %v3062_v6 }
0x116f   :  { %2724 = vmatprep.subr.bf16.mxu1 %v3525_v7 }
0x1172   :  { %2726 = vmatpush1.bf16.msra.mxu1 %v3533_v5 }
0x1173   :  { %2728 = vmatprep.subr.bf16.mxu1 %v3543_v20 }
0x1176   :  { %2730 = vmatpush1.bf16.msra.mxu1 %v3552_v26 }
0x1177   :  { %2732 = vmatprep.subr.bf16.mxu1 %v3562_v13 }
0x117a   :  { %2734 = vmatpush1.bf16.msra.mxu1 %v3570_v0 }
0x117b   :  { %2752 = vmatprep.subr.bf16.mxu1 %v3486_v3 }
0x1240   :  { %v1511_v31 = vpop.f32.mrb[12].mxu1 }
0x1241   :  { %v1518_v34 = vrot.slane %v1511_v31, 6  ;;  %v1513_v39 = vpop.f32.mrb[13].mxu1 }
0x1242   :  { %v1519_v40 = vrot.slane %v1513_v39, 6 }
0x1243   :  { %v1522_v41 = vadd.f32 %v1518_v34, %v3654_v24 }
0x1244   :  { %v1523_v1 = vadd.f32 %v1519_v40, %v3663_v15 }
0x1245   :  { %v2475_v42 = vmul.f32 -1.442695, %v1522_v41 }
0x1246   :  { %v2476_v43 = vmul.f32 -1.442695, %v1523_v1 }
0x1247   :  { %2930 = vpow2.f32 %v2475_v42 }
0x1248   :  { %2932 = vpow2.f32 %v2476_v43 }
0x1249   :  { %2934 = vtanh.f32 %v1523_v1 }
0x1251   :  { %v2931_v44 = vpop.eup %2930 }
0x1252   :  { %v2933_v45 = vpop.eup %2932  ;;  %v1532_v46 = vadd.f32 1.0, %v2931_v44 }
0x1253   :  { %v1533_v48 = vadd.f32 1.0, %v2933_v45  ;;  %v2935_v59 = vpop.eup %2934 }
0x1254   :  { %2936 = vrcp.f32 %v1532_v46 }
0x1255   :  { %2938 = vrcp.f32 %v1533_v48 }
0x125e   :  { %v2937_v51 = vpop.eup %2936 }
0x125f   :  { %v2939_v52 = vpop.eup %2938  ;;  %v1543_v55 = vmul.f32 %v2937_v51, %v1541_v50 }
0x1260   :  { %v1539_v56 = vsel %vm77_vm5, %v2935_v59, %v2939_v52 }
0x1261   :  { %v1544_v61 = vmul.f32 %v2937_v51, %v1539_v56 }
0x1263   :  { %1546 = vrot.lane.b32.xlu1 %v1544_v61, %s3063_s24 }
0x12d5   :  { %v1547_v62 = vpop.permute.xlu1 %1546 }
0x12d6   :  { %v1549_v8 = vadd.f32 %v1547_v62, %v1543_v55 }
0x12d8   :  { %2940 = vtanh.f32 %v1549_v8  ;;  %v1654_v54 = vrot.slane %v1549_v8, 6 }
0x12e2   :  { %v2941_v10 = vpop.eup %2940 }
0x12e3   :  { %v3688_v37 = vmul.f32 %v2941_v10, %v1539_v56 }
0x12e5   :  { %v1553_v9 = vrot.slane %v3688_v37, 2  ;;  %v2259_v40 = vsel %vm1142_vm6, %v3669_v36, %v3688_v37 }
0x12e7   :  { %1554 = vrot.lane.b32.xlu0 %v1553_v9, %s3063_s24 }
0x1359   :  { %v1555_v27 = vpop.permute.xlu0 %1554 }
0x135a   :  { %2477 = vmatmul.mubr.msk.f32.vlgmr.msra.gmra.mrb[14].mxu0 %vm212_vm2, %v1555_v27 }
0x135b   :  { %2738 = vmatpush1.bf16.msra.mxu0 %v3501_v47  ;;  %1856 = vmatprep.mubr.f32.mxu0 %v3062_v6 }
0x135c   :  { %2740 = vmatprep.subr.bf16.mxu0 %v3525_v7 }
0x135f   :  { %2742 = vmatpush1.bf16.msra.mxu0 %v3533_v5 }
0x1360   :  { %2744 = vmatprep.subr.bf16.mxu0 %v3543_v20 }
0x1363   :  { %2746 = vmatpush1.bf16.msra.mxu0 %v3552_v26 }
0x1364   :  { %2748 = vmatprep.subr.bf16.mxu0 %v3562_v13 }
0x1367   :  { %2750 = vmatpush1.bf16.msra.mxu0 %v3570_v0 }
0x1368   :  { %2768 = vmatprep.subr.bf16.mxu0 %v3486_v3 }
0x142d   :  { %v1624_v16 = vpop.f32.mrb[14].mxu0 }
0x142e   :  { %v1631_v2 = vrot.slane %v1624_v16, 4  ;;  %v1626_v18 = vpop.f32.mrb[15].mxu0 }
0x142f   :  { %v1632_v19 = vrot.slane %v1626_v18, 4 }
0x1430   :  { %v1635_v49 = vadd.f32 %v1631_v2, %v3650_v12 }
0x1431   :  { %v1636_v21 = vadd.f32 %v1632_v19, %v3659_v30 }
0x1432   :  { %v2478_v23 = vmul.f32 -1.442695, %v1635_v49 }
0x1433   :  { %v2479_v60 = vmul.f32 -1.442695, %v1636_v21 }
0x1434   :  { %2942 = vpow2.f32 %v2478_v23  ;;  %v2276_v23 = vrot.slane %v3688_v37, 6 }
0x1435   :  { %2944 = vpow2.f32 %v2479_v60 }
0x1436   :  { %2946 = vtanh.f32 %v1636_v21 }
0x143e   :  { %v2943_v25 = vpop.eup %2942 }
0x143f   :  { %v2945_v28 = vpop.eup %2944  ;;  %v1645_v53 = vadd.f32 1.0, %v2943_v25 }
0x1440   :  { %v1646_v58 = vadd.f32 1.0, %v2945_v28  ;;  %v2947_v29 = vpop.eup %2946 }
0x1441   :  { %2948 = vrcp.f32 %v1645_v53 }
0x1442   :  { %2950 = vrcp.f32 %v1646_v58 }
0x144b   :  { %v2949_v57 = vpop.eup %2948 }
0x144c   :  { %v2951_v22 = vpop.eup %2950  ;;  %v1656_v32 = vmul.f32 %v2949_v57, %v1654_v54 }
0x144d   :  { %v1652_v12 = vsel %vm77_vm5, %v2947_v29, %v2951_v22 }
0x144e   :  { %v1657_v30 = vmul.f32 %v2949_v57, %v1652_v12 }
0x1450   :  { %1659 = vrot.lane.b32.xlu1 %v1657_v30, %s3063_s24 }
0x14c2   :  { %v1660_v11 = vpop.permute.xlu1 %1659 }
0x14c3   :  { %v1662_v31 = vadd.f32 %v1660_v11, %v1656_v32 }
0x14c5   :  { %2952 = vtanh.f32 %v1662_v31  ;;  %v1767_v62 = vrot.slane %v1662_v31, 6 }
0x14cf   :  { %v2953_v34 = vpop.eup %2952 }
0x14d0   :  { %v1664_v39 = vmul.f32 %v2953_v34, %v1652_v12 }
0x14d2   :  { %v1666_v41 = vrot.slane %v1664_v39, 4  ;;  %v2260_v1 = vsel %vm120_vm0, %v2259_v40, %v1664_v39  ;;  %v2274_v21 = vrot.slane %v1664_v39, 2 }
0x14d4   :  { %1667 = vrot.lane.b32.xlu0 %v1666_v41, %s3063_s24 }
0x1546   :  { %v1668_v42 = vpop.permute.xlu0 %1667 }
0x1547   :  { %2480 = vmatmul.mubr.msk.f32.vlgmr.msra.gmra.mrb[14].mxu1 %vm212_vm2, %v1668_v42 }
0x1548   :  { %2754 = vmatpush1.bf16.msra.mxu1 %v3501_v47  ;;  %1968 = vmatprep.mubr.f32.mxu1 %v3062_v6 }
0x1549   :  { %2756 = vmatprep.subr.bf16.mxu1 %v3525_v7 }
0x154c   :  { %2758 = vmatpush1.bf16.msra.mxu1 %v3533_v5 }
0x154d   :  { %2760 = vmatprep.subr.bf16.mxu1 %v3543_v20 }
0x1550   :  { %2762 = vmatpush1.bf16.msra.mxu1 %v3552_v26 }
0x1551   :  { %2764 = vmatprep.subr.bf16.mxu1 %v3562_v13 }
0x1554   :  { %2766 = vmatpush1.bf16.msra.mxu1 %v3570_v0 }
0x1555   :  { %2784 = vmatprep.subr.bf16.mxu1 %v3486_v3 }
0x161a   :  { %v1737_v43 = vpop.f32.mrb[14].mxu1 }
0x161b   :  { %v1744_v44 = vrot.slane %v1737_v43, 2  ;;  %v1739_v45 = vpop.f32.mrb[15].mxu1 }
0x161c   :  { %v1745_v46 = vrot.slane %v1739_v45, 2 }
0x161d   :  { %v1748_v48 = vadd.f32 %v1744_v44, %v3654_v24 }
0x161e   :  { %v1749_v59 = vadd.f32 %v1745_v46, %v3663_v15 }
0x161f   :  { %v2481_v50 = vmul.f32 -1.442695, %v1748_v48 }
0x1620   :  { %v2482_v51 = vmul.f32 -1.442695, %v1749_v59 }
0x1621   :  { %2954 = vpow2.f32 %v2481_v50 }
0x1622   :  { %2956 = vpow2.f32 %v2482_v51 }
0x1623   :  { %2958 = vtanh.f32 %v1749_v59 }
0x162b   :  { %v2955_v52 = vpop.eup %2954 }
0x162c   :  { %v2957_v55 = vpop.eup %2956  ;;  %v1758_v56 = vadd.f32 1.0, %v2955_v52 }
0x162d   :  { %v1759_v61 = vadd.f32 1.0, %v2957_v55  ;;  %v2959_v3 = vpop.eup %2958 }
0x162e   :  { %2960 = vrcp.f32 %v1758_v56 }
0x162f   :  { %2962 = vrcp.f32 %v1759_v61 }
0x1638   :  { %v2961_v8 = vpop.eup %2960 }
0x1639   :  { %v2963_v10 = vpop.eup %2962  ;;  %v1769_v9 = vmul.f32 %v2961_v8, %v1767_v62 }
0x163a   :  { %v1765_v24 = vsel %vm77_vm5, %v2959_v3, %v2963_v10 }
0x163b   :  { %v1770_v15 = vmul.f32 %v2961_v8, %v1765_v24 }
0x163d   :  { %1772 = vrot.lane.b32.xlu1 %v1770_v15, %s3063_s24 }
0x16af   :  { %v1773_v27 = vpop.permute.xlu1 %1772 }
0x16b0   :  { %v1775_v16 = vadd.f32 %v1773_v27, %v1769_v9 }
0x16b2   :  { %2964 = vtanh.f32 %v1775_v16  ;;  %v1882_v31 = vrot.slane %v1775_v16, 6 }
0x16bc   :  { %v2965_v2 = vpop.eup %2964 }
0x16bd   :  { %v1777_v18 = vmul.f32 %v2965_v2, %v1765_v24 }
0x16bf   :  { %v1787_v19 = vrot.slane %v1777_v18, 6  ;;  %v3728_v49 = vsel %vm1145_vm7, %v2260_v1, %v1777_v18 }
0x16c1   :  { %1788 = vrot.lane.b32.xlu0 %v1787_v19, %s3063_s24  ;;  %v2283_v60 = vsel %vm1142_vm6, %v1787_v19, %v2274_v21 }
0x16c2   :  { %v3734_v25 = vsel %vm120_vm0, %v2283_v60, %v2276_v23 }
0x1733   :  { %v1789_v28 = vpop.permute.xlu0 %1788 }
0x1734   :  { %2483 = vmatmul.mubr.msk.f32.vlgmr.msra.gmra.mrb[16].mxu0 %vm212_vm2, %v1789_v28 }
0x1735   :  { %2770 = vmatpush1.bf16.msra.mxu0 %v3501_v47  ;;  %2081 = vmatprep.mubr.f32.mxu0 %v3062_v6 }
0x1736   :  { %2772 = vmatprep.subr.bf16.mxu0 %v3525_v7 }
0x1739   :  { %2774 = vmatpush1.bf16.msra.mxu0 %v3533_v5 }
0x173a   :  { %2776 = vmatprep.subr.bf16.mxu0 %v3543_v20 }
0x173d   :  { %2778 = vmatpush1.bf16.msra.mxu0 %v3552_v26 }
0x173e   :  { %2780 = vmatprep.subr.bf16.mxu0 %v3562_v13 }
0x1741   :  { %2782 = vmatpush1.bf16.msra.mxu0 %v3570_v0 }
0x1807   :  { %v1858_v37 = vpop.f32.mrb[16].mxu0 }
0x1808   :  { %v1863_v53 = vadd.f32 %v1858_v37, %v3634_v35  ;;  %v1860_v58 = vpop.f32.mrb[17].mxu0 }
0x1809   :  { %v1864_v29 = vadd.f32 %v1860_v58, %v3642_v14 }
0x180a   :  { %v2484_v54 = vmul.f32 -1.442695, %v1863_v53 }
0x180b   :  { %v2485_v57 = vmul.f32 -1.442695, %v1864_v29 }
0x180c   :  { %2966 = vpow2.f32 %v2484_v54 }
0x180d   :  { %2968 = vpow2.f32 %v2485_v57 }
0x180e   :  { %2970 = vtanh.f32 %v1864_v29 }
0x1816   :  { %v2967_v22 = vpop.eup %2966 }
0x1817   :  { %v2969_v32 = vpop.eup %2968  ;;  %v1873_v12 = vadd.f32 1.0, %v2967_v22 }
0x1818   :  { %v1874_v30 = vadd.f32 1.0, %v2969_v32  ;;  %v2971_v11 = vpop.eup %2970 }
0x1819   :  { %2972 = vrcp.f32 %v1873_v12 }
0x181a   :  { %2974 = vrcp.f32 %v1874_v30 }
0x1823   :  { %v2973_v34 = vpop.eup %2972 }
0x1824   :  { %v2975_v39 = vpop.eup %2974  ;;  %v1884_v40 = vmul.f32 %v2973_v34, %v1882_v31 }
0x1825   :  { %v1880_v41 = vsel %vm77_vm5, %v2971_v11, %v2975_v39 }
0x1826   :  { %v1885_v1 = vmul.f32 %v2973_v34, %v1880_v41 }
0x1828   :  { %1887 = vrot.lane.b32.xlu1 %v1885_v1, %s3063_s24 }
0x189a   :  { %v1888_v42 = vpop.permute.xlu1 %1887 }
0x189b   :  { %v1890_v43 = vadd.f32 %v1888_v42, %v1884_v40 }
0x189d   :  { %2976 = vtanh.f32 %v1890_v43 }
0x18a7   :  { %v2977_v44 = vpop.eup %2976 }
0x18a8   :  { %v3750_v45 = vmul.f32 %v2977_v44, %v1880_v41 }
0x18aa   :  { %1900 = vrot.lane.b32.xlu0 %v3750_v45, %s3063_s24 }
0x191c   :  { %v1901_v46 = vpop.permute.xlu0 %1900 }
0x191d   :  { %2486 = vmatmul.mubr.msk.f32.vlgmr.msra.gmra.mrb[16].mxu1 %vm212_vm2, %v1901_v46 }
0x191e   :  { %2786 = vmatpush1.bf16.msra.mxu1 %v3501_v47  ;;  %2194 = vmatprep.mubr.f32.mxu1 %v3062_v6 }
0x191f   :  { %2788 = vmatprep.subr.bf16.mxu1 %v3525_v7 }
0x1922   :  { %2790 = vmatpush1.bf16.msra.mxu1 %v3533_v5 }
0x1923   :  { %2792 = vmatprep.subr.bf16.mxu1 %v3543_v20 }
0x1926   :  { %2794 = vmatpush1.bf16.msra.mxu1 %v3552_v26 }
0x1927   :  { %2796 = vmatprep.subr.bf16.mxu1 %v3562_v13 }
0x192a   :  { %2798 = vmatpush1.bf16.msra.mxu1 %v3570_v0  ;;  %v2000_v0 = vrot.slane %v1890_v43, 6 }
0x19f0   :  { %v1970_v48 = vpop.f32.mrb[16].mxu1 }
0x19f1   :  { %v1977_v59 = vrot.slane %v1970_v48, 6  ;;  %v1972_v50 = vpop.f32.mrb[17].mxu1 }
0x19f2   :  { %v1978_v51 = vrot.slane %v1972_v50, 6 }
0x19f3   :  { %v1981_v47 = vadd.f32 %v1977_v59, %v3638_v33 }
0x19f4   :  { %v1982_v6 = vadd.f32 %v1978_v51, %v3646_v17 }
0x19f5   :  { %v2487_v52 = vmul.f32 -1.442695, %v1981_v47 }
0x19f6   :  { %v2488_v7 = vmul.f32 -1.442695, %v1982_v6 }
0x19f7   :  { %2978 = vpow2.f32 %v2487_v52 }
0x19f8   :  { %2980 = vpow2.f32 %v2488_v7 }
0x19f9   :  { %2982 = vtanh.f32 %v1982_v6 }
0x1a01   :  { %v2979_v5 = vpop.eup %2978 }
0x1a02   :  { %v2981_v20 = vpop.eup %2980  ;;  %v1991_v55 = vadd.f32 1.0, %v2979_v5 }
0x1a03   :  { %v1992_v26 = vadd.f32 1.0, %v2981_v20  ;;  %v2983_v13 = vpop.eup %2982 }
0x1a04   :  { %2984 = vrcp.f32 %v1991_v55 }
0x1a05   :  { %2986 = vrcp.f32 %v1992_v26 }
0x1a0e   :  { %v2985_v56 = vpop.eup %2984 }
0x1a0f   :  { %v2987_v61 = vpop.eup %2986  ;;  %v2002_v3 = vmul.f32 %v2985_v56, %v2000_v0  ;;  %v2304_v0 = vld [vmem:[%s3897_s7] sm:$0xff] }
0x1a10   :  { %v1998_v62 = vsel %vm77_vm5, %v2983_v13, %v2987_v61  ;;  %v2306_v61 = vld [vmem:[%s3897_s7 + $0x10] sm:$0xff] }
0x1a11   :  { %v2003_v8 = vmul.f32 %v2985_v56, %v1998_v62  ;;  %v2305_v56 = vld [vmem:[%s3897_s7 + $0x8] sm:$0xff] }
0x1a13   :  { %2005 = vrot.lane.b32.xlu1 %v2003_v8, %s3063_s24 }
0x1a85   :  { %v2006_v10 = vpop.permute.xlu1 %2005 }
0x1a86   :  { %v2008_v9 = vadd.f32 %v2006_v10, %v2002_v3  ;;  %v2799_v3 = vpack.c.bf16 %v2305_v56, %v2304_v0 }
0x1a88   :  { %2988 = vtanh.f32 %v2008_v9  ;;  %v2113_v22 = vrot.slane %v2008_v9, 6  ;;  %2800 = vmatprep.subr.bf16.mxu0 %v2799_v3  ;;  %v2308_v9 = vld [vmem:[%s3897_s7 + $0x20] sm:$0xff] }
0x1a92   :  { %v2989_v24 = vpop.eup %2988 }
0x1a93   :  { %v3768_v15 = vmul.f32 %v2989_v24, %v1998_v62  ;;  %v2803_v62 = vpack.c.bf16 %v2307_v38, %v2306_v61  ;;  %v2309_v24 = vld [vmem:[%s3897_s7 + $0x28] sm:$0xff] }
0x1a95   :  { %v2012_v27 = vrot.slane %v3768_v15, 2  ;;  %v2262_v40 = vsel %vm1142_vm6, %v3750_v45, %v3768_v15 }
0x1a97   :  { %2013 = vrot.lane.b32.xlu0 %v2012_v27, %s3063_s24  ;;  %v2807_v27 = vpack.c.bf16 %v2309_v24, %v2308_v9 }
0x1b09   :  { %v2014_v16 = vpop.permute.xlu0 %2013 }
0x1b0a   :  { %2489 = vmatmul.mubr.msk.f32.vlgmr.msra.gmra.mrb[18].mxu0 %vm212_vm2, %v2014_v16  ;;  %v2310_v16 = vld [vmem:[%s3897_s7 + $0x30] sm:$0xff] }
0x1b0b   :  { %2802 = vmatpush3.bf16.msra.mxu0 %v2799_v3 }
0x1b0c   :  { %2804 = vmatprep.subr.bf16.mxu0 %v2803_v62 }
0x1b0f   :  { %2806 = vmatpush3.bf16.msra.mxu0 %v2803_v62 }
0x1b10   :  { %2808 = vmatprep.subr.bf16.mxu0 %v2807_v27 }
0x1b13   :  { %2810 = vmatpush3.bf16.msra.mxu0 %v2807_v27 }
0x1bdd   :  { %v2083_v2 = vpop.f32.mrb[18].mxu0 }
0x1bde   :  { %v2090_v18 = vrot.slane %v2083_v2, 4  ;;  %v2085_v19 = vpop.f32.mrb[19].mxu0  ;;  %v2311_v2 = vld [vmem:[%s3897_s7 + $0x38] sm:$0xff]  ;;  %s3064_s7 = smov 32  }
0x1bdf   :  { %v2091_v21 = vrot.slane %v2085_v19, 4 }
0x1be0   :  { %v2094_v23 = vadd.f32 %v2090_v18, %v3634_v35  ;;  %v2811_v18 = vpack.c.bf16 %v2311_v2, %v2310_v16 }
0x1be1   :  { %v2095_v60 = vadd.f32 %v2091_v21, %v3642_v14 }
0x1be2   :  { %v2490_v28 = vmul.f32 -1.442695, %v2094_v23  ;;  %2812 = vmatprep.subr.bf16.mxu0 %v2811_v18 }
0x1be3   :  { %v2491_v37 = vmul.f32 -1.442695, %v2095_v60  ;;  %2814 = vmatpush3.bf16.msra.mxu0 %v2811_v18 }
0x1be4   :  { %2990 = vpow2.f32 %v2490_v28 }
0x1be5   :  { %2992 = vpow2.f32 %v2491_v37  ;;  %v2269_v37 = vrot.slane %v3768_v15, 6 }
0x1be6   :  { %2994 = vtanh.f32 %v2095_v60 }
0x1bee   :  { %v2991_v53 = vpop.eup %2990 }
0x1bef   :  { %v2993_v58 = vpop.eup %2992  ;;  %v2104_v29 = vadd.f32 1.0, %v2991_v53  ;;  %v2271_v53 = vrot.slane %v3750_v45, 2 }
0x1bf0   :  { %v2105_v54 = vadd.f32 1.0, %v2993_v58  ;;  %v2995_v57 = vpop.eup %2994 }
0x1bf1   :  { %2996 = vrcp.f32 %v2104_v29 }
0x1bf2   :  { %2998 = vrcp.f32 %v2105_v54 }
0x1bfb   :  { %v2997_v32 = vpop.eup %2996 }
0x1bfc   :  { %v2999_v12 = vpop.eup %2998  ;;  %v2115_v30 = vmul.f32 %v2997_v32, %v2113_v22 }
0x1bfd   :  { %v2111_v35 = vsel %vm77_vm5, %v2995_v57, %v2999_v12  ;;  %v2278_v57 = vrot.slane %v3669_v36, 2 }
0x1bfe   :  { %v2116_v14 = vmul.f32 %v2997_v32, %v2111_v35 }
0x1bff   :  { %v2285_v22 = vsel %vm1145_vm7, %v3734_v25, %v2278_v57 }
0x1c00   :  { %2118 = vrot.lane.b32.xlu1 %v2116_v14, %s3063_s24 }
0x1c72   :  { %v2119_v11 = vpop.permute.xlu1 %2118 }
0x1c73   :  { %v2121_v31 = vadd.f32 %v2119_v11, %v2115_v30 }
0x1c75   :  { %3000 = vtanh.f32 %v2121_v31  ;;  %v2226_v20 = vrot.slane %v2121_v31, 6 }
0x1c7f   :  { %v3001_v34 = vpop.eup %3000 }
0x1c80   :  { %v3778_v39 = vmul.f32 %v3001_v34, %v2111_v35 }
0x1c82   :  { %v2125_v41 = vrot.slane %v3778_v39, 4  ;;  %v2263_v1 = vsel %vm120_vm0, %v2262_v40, %v3778_v39  ;;  %v2267_v28 = vrot.slane %v3778_v39, 2 }
0x1c84   :  { %2126 = vrot.lane.b32.xlu0 %v2125_v41, %s3063_s24 }
0x1c88   :  { %2288 = vrot.lane.b32.xlu0 %v3728_v49, %s3063_s24 }
0x1cf6   :  { %v2127_v42 = vpop.permute.xlu0 %2126 }
0x1cf7   :  { %2492 = vmatmul.mubr.msk.f32.vlgmr.msra.gmra.mrb[18].mxu1 %vm212_vm2, %v2127_v42 }
0x1cfa   :  { %v2289_v36 = vpop.permute.xlu0 %2288 }
0x1dca   :  { %v2196_v43 = vpop.f32.mrb[18].mxu1 }
0x1dcb   :  { %v2203_v44 = vrot.slane %v2196_v43, 2  ;;  %v2198_v46 = vpop.f32.mrb[19].mxu1 }
0x1dcc   :  { %v2204_v48 = vrot.slane %v2198_v46, 2 }
0x1dcd   :  { %v2207_v59 = vadd.f32 %v2203_v44, %v3638_v33 }
0x1dce   :  { %v2208_v50 = vadd.f32 %v2204_v48, %v3646_v17 }
0x1dcf   :  { %v2493_v51 = vmul.f32 -1.442695, %v2207_v59 }
0x1dd0   :  { %v2494_v47 = vmul.f32 -1.442695, %v2208_v50 }
0x1dd1   :  { %3002 = vpow2.f32 %v2493_v51 }
0x1dd2   :  { %3004 = vpow2.f32 %v2494_v47 }
0x1dd3   :  { %3006 = vtanh.f32 %v2208_v50 }
0x1ddb   :  { %v3003_v6 = vpop.eup %3002 }
0x1ddc   :  { %v3005_v52 = vpop.eup %3004  ;;  %v2217_v7 = vadd.f32 1.0, %v3003_v6 }
0x1ddd   :  { %v2218_v49 = vadd.f32 1.0, %v3005_v52  ;;  %v3007_v5 = vpop.eup %3006 }
0x1dde   :  { %3008 = vrcp.f32 %v2217_v7 }
0x1ddf   :  { %3010 = vrcp.f32 %v2218_v49 }
0x1de8   :  { %v3009_v55 = vpop.eup %3008 }
0x1de9   :  { %v3011_v26 = vpop.eup %3010  ;;  %v2228_v13 = vmul.f32 %v3009_v55, %v2226_v20 }
0x1dea   :  { %v2224_v33 = vsel %vm77_vm5, %v3007_v5, %v3011_v26 }
0x1deb   :  { %v2229_v17 = vmul.f32 %v3009_v55, %v2224_v33 }
0x1ded   :  { %2231 = vrot.lane.b32.xlu1 %v2229_v17, %s3063_s24 }
0x1e5f   :  { %v2232_v8 = vpop.permute.xlu1 %2231 }
0x1e60   :  { %v2234_v10 = vadd.f32 %v2232_v8, %v2228_v13 }
0x1e62   :  { %3012 = vtanh.f32 %v2234_v10 }
0x1e6c   :  { %v3013_v19 = vpop.eup %3012 }
0x1e6d   :  { %v2236_v21 = vmul.f32 %v3013_v19, %v2224_v33 }
0x1e6f   :  { %v2264_v23 = vsel %vm1145_vm7, %v2263_v1, %v2236_v21  ;;  %v2265_v60 = vrot.slane %v2236_v21, 6 }
0x1e70   :  { %2290 = vrot.lane.b32.xlu0 %v2264_v23, %s3063_s24 }
0x1e71   :  { %v2280_v58 = vsel %vm1142_vm6, %v2265_v60, %v2267_v28 }
0x1e72   :  { %v2281_v29 = vsel %vm120_vm0, %v2280_v58, %v2269_v37 }
0x1e73   :  { %v2282_v54 = vsel %vm1145_vm7, %v2281_v29, %v2271_v53 }
0x1e74   :  { %1122 = vrot.lane.b32.xlu0 %v3574_v4, %s3063_s24  ;;  %2296 = vrot.lane.b32.xlu1 %v2282_v54, %s3063_s24 }
0x1e78   :  { %1133 = vrot.lane.b32.xlu0 %v3504_v63, %s3063_s24  ;;  %2298 = vrot.lane.b32.xlu1 %v2285_v22, %s3063_s24 }
0x1e7c   :  { %2238 = vrot.lane.b32.xlu0 %v2236_v21, %s3063_s24  ;;  %1127 = vrot.lane.b32.xlu1 %v3574_v4, %s3064_s7 }
0x1e80   :  { %2249 = vrot.lane.b32.xlu0 %v2234_v10, %s3063_s24  ;;  %1137 = vrot.lane.b32.xlu1 %v3504_v63, %s3064_s7  ;;  %s3065_s24 = smov [#allocation3]  }
0x1e81   :  { %s2410_s29 = sshll.u32 %s3065_s24, 4  ;;  %s2411_s29 = int_to_ptr.vmem [resolvable:$true] %s2410_s29 }
0x1e82   :  { %s3014_s14 = scalar_lea.vmem %s2411_s29, 128  ;;  %p3019_p1 = scmp.lt.s32.totalorder %s2411_s29, %s2411_s29 }
0x1e83   :  { %p3015_p0 = scmp.ne.s32.totalorder %s2411_s29, %s3014_s14  ;;  %p3020_p2 = scmp.lt.s32.totalorder %s3014_s14, %s3014_s14 }
0x1e84   :  { %2243 = vrot.lane.b32.xlu1 %v2236_v21, %s3064_s7 }
0x1e85   :  { %p3021_p3 = por %p3020_p2, %p3019_p1 }
0x1e87   :  { %p3022_p4 = pnand %p3021_p3, %p3015_p0 }
0x1e88   :  { %2254 = vrot.lane.b32.xlu1 %v2234_v10, %s3064_s7 }
0x1ee2   :  { %v2291_v25 = vpop.permute.xlu0 %2290 }
0x1ee6   :  { %v1123_v45 = vpop.permute.xlu0 %1122  ;;  %v2297_v15 = vpop.permute.xlu1 %2296 }
0x1ee7   :  { %1126 = vst.msk [vmem:[#allocation3 - $0x6] sm:$0xc0] %vm1125_vm9, %v1123_v45  ;;  %v2302_v32 = vsel %vm1187_vm8, %v2289_v36, %v2297_v15 }
0x1ee8   :  { %2524 = vmatprep.mubr.msk.f32.mxu0 %vm212_vm2, %v2302_v32 }
0x1eea   :  { %v1134_v4 = vpop.permute.xlu0 %1133  ;;  %v2299_v12 = vpop.permute.xlu1 %2298 }
0x1eeb   :  { %1136 = vst.msk [vmem:[#allocation5 - $0x6] sm:$0xc0] %vm1125_vm9, %v1134_v4  ;;  %v2303_v63 = vsel %vm1187_vm8, %v2291_v25, %v2299_v12 }
0x1eec   :  { %2525 = vmatmul.mubr.msk.f32.vlgmr.msra.gmra.mrb[20].mxu0 %vm212_vm2, %v2303_v63 }
0x1eee   :  { %v2239_v30 = vpop.permute.xlu0 %2238  ;;  %v1128_v35 = vpop.permute.xlu1 %1127 }
0x1eef   :  { %2242 = vst.msk [vmem:[#allocation3 - $0x2] sm:$0xc0] %vm1125_vm9, %v2239_v30  ;;  %1131 = vst.msk [vmem:[#allocation3 - $0x4] sm:$0xc0] %vm1125_vm9, %v1128_v35 }
0x1ef2   :  { %v2250_v14 = vpop.permute.xlu0 %2249  ;;  %v1138_v11 = vpop.permute.xlu1 %1137 }
0x1ef3   :  { %2253 = vst.msk [vmem:[#allocation5 - $0x2] sm:$0xc0] %vm1125_vm9, %v2250_v14  ;;  %1141 = vst.msk [vmem:[#allocation5 - $0x4] sm:$0xc0] %vm1125_vm9, %v1138_v11 }
0x1ef6   :  { %v2244_v31 = vpop.permute.xlu1 %2243 }
0x1ef7   :  { %2247 = vst.msk [vmem:[#allocation3] sm:$0xc0] %vm1125_vm9, %v2244_v31 }
0x1efa   :  { %v2255_v34 = vpop.permute.xlu1 %2254 }
0x1efb   :  { %2258 = vst.msk [vmem:[#allocation5] sm:$0xc0] %vm1125_vm9, %v2255_v34 }
0x1efc   :  { %3025 = shalt.err (!%p3022_p4)
}
0x1efd   :  { %s3026_s5 = scalar_lea.hbm %s3902_s12, 128 }
0x1efe   :  { %p3027_p5 = scmp.ne.s32.totalorder %s3902_s12, %s3026_s5  ;;  %p3030_p6 = scmp.lt.u32.totalorder %s3026_s5, %s3902_s12 }
0x1f00   :  { %p3032_p7 = pnand %p3030_p6, %p3027_p5 }
0x1f02   :  { %3035 = shalt.err (!%p3032_p7)
}
0x1f03   :  { %s3067_s16 = smov 2   ;;  %s3036_s18 = scalar_lea.vmem %s2423_s2, 128 }
0x1f04   :  { %2416 = dma.vmem_to_hbm [thread:$0]  %s2411_s29, 128, %s3902_s12, [#allocation4], %s3064_s7, %s3064_s7, %s3067_s16  }
0x1f05   :  { %p3037_p8 = scmp.ne.s32.totalorder %s2423_s2, %s3036_s18  ;;  %p3041_p9 = scmp.lt.s32.totalorder %s2423_s2, %s2423_s2 }
0x1f06   :  { %p3042_p10 = scmp.lt.s32.totalorder %s3036_s18, %s3036_s18 }
0x1f08   :  { %p3043_p11 = por %p3042_p10, %p3041_p9 }
0x1f0a   :  { %p3044_p12 = pnand %p3043_p11, %p3037_p8 }
0x1f0c   :  { %3047 = shalt.err (!%p3044_p12)
}
0x1f0d   :  { %s3048_s20 = scalar_lea.hbm %s3903_s13, 128 }
0x1f0e   :  { %p3049_p13 = scmp.ne.s32.totalorder %s3903_s13, %s3048_s20  ;;  %p3052_p0 = scmp.lt.u32.totalorder %s3048_s20, %s3903_s13 }
0x1f10   :  { %p3054_p1 = pnand %p3052_p0, %p3049_p13 }
0x1f12   :  { %3057 = shalt.err (!%p3054_p1)
}
0x1f13   :  { %2428 = dma.vmem_to_hbm [thread:$0]  %s2423_s2, 128, %s3903_s13, [#allocation6], %s3064_s7, %s3064_s7, %s3067_s16   ;;  %v2495_v39 = vld [vmem:[#allocation2] ss:$0 sm:$0xff]  ;;  %vm2400_vm10 = vcmask 7168  }
0x1fbf   :  { %v2526_v40 = vpop.f32.mrb[20].mxu0 }
0x1fc0   :  { %v2397_v41 = vadd.f32 %v2526_v40, %v2495_v39  ;;  %v2391_v1 = vpop.f32.mrb[21].mxu0 }
0x1fc1   :  { %v2392_v42 = vadd.f32 %v2495_v39, %v2391_v1 }
0x1fc2   :  { %2402 = vst.msk [vmem:[%s3901_s11 + $0x8] sm:$0xff] %vm2400_vm10, %v2397_v41 }
0x1fc3   :  { %2401 = vst.msk [vmem:[%s3901_s11] sm:$0xff] %vm2400_vm10, %v2392_v42 }
0x1fc4   :  { %3058 = dma.done.wait [#allocation4], 128  }
0x1fc5   :  { %3059 = vsyncadd [#allocation4], 4294967168 }
0x1fc6   :  { %3060 = dma.done.wait [#allocation6], 128  }
0x1fc7   :  { %3061 = vsyncadd [#allocation6], 4294967168 }
0x1fc8   :  { %2437 = vsyncpa [#allocation4], 1 }
0x1fc9   :  { %2438 = vsyncpa [#allocation6], 1 }

</bundles_post_ra>
